<compile_context>
chip_gen: v7x
topology: tpu7x:2x2x1
jax: 0.10.0
libtpu: 0.0.40
codegen_flags: <defaults>
</compile_context>

<pallas_src>
import functools

import jax
import jax.numpy as jnp
from jax.experimental import pallas as pl
from jax.experimental.pallas import tpu as pltpu


# 3x3 conv tap offsets, (kh, kw)-major order matching the packed weight layout.
_TAP_OFFSETS = tuple((dy, dx) for dy in (-1, 0, 1) for dx in (-1, 0, 1))


def _slab_layout(c_in, c_mid, embed, hidden):
    """Row offsets of each parameter block inside the single packed slab."""
    def rnd8(x):
        return ((x + 7) // 8) * 8
    lane = max(c_in, c_mid, embed, hidden)
    lay = {}
    r = 0
    lay["conv_w"] = r; r += rnd8(9 * c_mid)   # 9 taps, each [c_mid, c_in]
    lay["conv_b"] = r; r += rnd8(c_mid)       # column vector in lane 0
    lay["fc_w"] = r; r += rnd8(c_mid)         # [c_mid, embed]
    lay["w1"] = r; r += rnd8(embed)           # [embed, hidden]
    lay["w2"] = r; r += rnd8(hidden)          # [hidden, embed]
    lay["fc_b"] = r; r += 8                   # row vector
    lay["b1"] = r; r += 8
    lay["b2"] = r; r += 8
    return lay, r, lane


# ----------------------------------------------------------------------------
# Fused Pallas kernel: (visual conv+pool+fc+L2) + (share fc+ReLU+fc+L2) for
# both images of the pair, weights loaded once.
# ----------------------------------------------------------------------------
def _fused_pair_kernel(x1_ref, x2_ref, slab_ref,
                       f1_ref, g1_ref, f2_ref, g2_ref,
                       *, n, c_in, c_mid, h, w, embed, hidden):
    hw = h * w
    lay, _, _ = _slab_layout(c_in, c_mid, embed, hidden)

    # ---- unpack weights: static sub-slices of the single VMEM slab ---------
    w_taps = [slab_ref[lay["conv_w"] + t * c_mid:
                       lay["conv_w"] + (t + 1) * c_mid, 0:c_in]
              for t in range(9)]                                    # [c_mid, c_in]
    bconv = slab_ref[lay["conv_b"]:lay["conv_b"] + c_mid, 0:1]      # [c_mid, 1]
    fcw = slab_ref[lay["fc_w"]:lay["fc_w"] + c_mid, 0:embed]        # [c_mid, embed]
    w1 = slab_ref[lay["w1"]:lay["w1"] + embed, 0:hidden]            # [embed, hidden]
    w2 = slab_ref[lay["w2"]:lay["w2"] + hidden, 0:embed]            # [hidden, embed]
    fcb = slab_ref[lay["fc_b"]:lay["fc_b"] + 1, 0:embed]            # [1, embed]
    b1 = slab_ref[lay["b1"]:lay["b1"] + 1, 0:hidden]
    b2 = slab_ref[lay["b2"]:lay["b2"] + 1, 0:embed]

    # ---- per-tap validity masks over the flattened H*W lane axis -----------
    col = jax.lax.broadcasted_iota(jnp.int32, (1, hw), 1)
    if (w & (w - 1)) == 0:                     # power-of-two width: bit ops
        row_i = col >> (w.bit_length() - 1)
        col_i = col & (w - 1)
    else:                                      # TODO(synk): general W uses int div
        row_i = col // w
        col_i = col - row_i * w
    masks = []
    for (dy, dx) in _TAP_OFFSETS:
        conds = []
        if dy < 0:
            conds.append(row_i >= -dy)
        if dy > 0:
            conds.append(row_i < h - dy)
        if dx < 0:
            conds.append(col_i >= -dx)
        if dx > 0:
            conds.append(col_i < w - dx)
        m = None
        for c in conds:
            m = c if m is None else (m & c)
        masks.append(m)                        # None for the center tap

    def l2_normalize(y):
        # torch F.normalize: y / max(||y||, eps) == y * rsqrt(max(||y||^2, eps^2))
        ss = jnp.sum(y * y, axis=-1, keepdims=True)
        return y * jax.lax.rsqrt(jnp.maximum(ss, 1e-24))

    def encode(x_ref, f_ref, g_ref):
        for b in range(n):
            xb = x_ref[b]                                        # [c_in, hw] lane-dense
            acc = None
            for t, (dy, dx) in enumerate(_TAP_OFFSETS):
                offv = dy * w + dx
                xs = xb if offv == 0 else pltpu.roll(xb, shift=(-offv) % hw, axis=1)
                if masks[t] is not None:
                    xs = jnp.where(masks[t], xs, 0.0)
                d = jnp.dot(w_taps[t], xs, preferred_element_type=jnp.float32)
                acc = d if acc is None else acc + d              # [c_mid, hw]
            acc = jnp.maximum(acc + bconv, 0.0)                  # conv bias + ReLU
            pooled = jnp.sum(acc, axis=-1, keepdims=True) * (1.0 / hw)   # [c_mid, 1]

            # fc over c_mid as broadcast-mul + sublane reduce (keeps the result
            # row-oriented / lane-dense without any transpose), then L2 norm.
            f = jnp.sum(pooled * fcw, axis=0, keepdims=True) + fcb        # [1, embed]
            f_ref[b:b + 1, :] = l2_normalize(f)

        # Shared encoder, batched over the n rows just written.
        f_all = f_ref[...]                                       # [n, embed]
        hdn = jnp.maximum(
            jnp.dot(f_all, w1, preferred_element_type=jnp.float32) + b1, 0.0)
        g = jnp.dot(hdn, w2, preferred_element_type=jnp.float32) + b2
        g_ref[...] = l2_normalize(g)

    encode(x1_ref, f1_ref, g1_ref)
    encode(x2_ref, f2_ref, g2_ref)


# ----------------------------------------------------------------------------
# Parameter init + one-time pre-packing
# ----------------------------------------------------------------------------
def init_params(key, c_in=4, c_mid=8, embed=32, hidden=32):
    ks = jax.random.split(key, 8)
    s = 0.05
    return {
        "visual": {
            "conv_w": s * jax.random.normal(ks[0], (c_mid, c_in, 3, 3), jnp.float32),
            "conv_b": s * jax.random.normal(ks[1], (c_mid,), jnp.float32),
            "fc_w": s * jax.random.normal(ks[2], (c_mid, embed), jnp.float32),
            "fc_b": s * jax.random.normal(ks[3], (embed,), jnp.float32),
        },
        "share": {
            "w1": s * jax.random.normal(ks[4], (embed, hidden), jnp.float32),
            "b1": s * jax.random.normal(ks[5], (hidden,), jnp.float32),
            "w2": s * jax.random.normal(ks[6], (hidden, embed), jnp.float32),
            "b2": s * jax.random.normal(ks[7], (embed,), jnp.float32),
        },
    }


def prepack_params(params):
    """Pack every weight/bias into one lane-dense f32 slab, ONCE at init."""
    vp, sp = params["visual"], params["share"]
    c_mid, c_in, kh, kw = vp["conv_w"].shape
    assert (kh, kw) == (3, 3)
    embed = vp["fc_w"].shape[1]
    hidden = sp["w1"].shape[1]
    lay, rows, lane = _slab_layout(c_in, c_mid, embed, hidden)

    slab = jnp.zeros((rows, lane), jnp.float32)
    # [c_out, c_in, kh, kw] -> [kh, kw, c_out, c_in] -> [9*c_mid, c_in]
    # (tap-major; block t = (kh*3+kw) holds W_tap[c_out, c_in]).
    wtaps = jnp.transpose(vp["conv_w"], (2, 3, 0, 1)).reshape(9 * c_mid, c_in)
    slab = slab.at[lay["conv_w"]:lay["conv_w"] + 9 * c_mid, :c_in].set(wtaps)
    slab = slab.at[lay["conv_b"]:lay["conv_b"] + c_mid, 0].set(vp["conv_b"])
    slab = slab.at[lay["fc_w"]:lay["fc_w"] + c_mid, :embed].set(vp["fc_w"])
    slab = slab.at[lay["w1"]:lay["w1"] + embed, :hidden].set(sp["w1"])
    slab = slab.at[lay["w2"]:lay["w2"] + hidden, :embed].set(sp["w2"])
    slab = slab.at[lay["fc_b"], :embed].set(vp["fc_b"])
    slab = slab.at[lay["b1"], :hidden].set(sp["b1"])
    slab = slab.at[lay["b2"], :embed].set(sp["b2"])

    return {
        "slab": slab.astype(jnp.float32),
        "dims": dict(c_in=int(c_in), c_mid=int(c_mid),
                     embed=int(embed), hidden=int(hidden)),
    }


# ----------------------------------------------------------------------------
# MCRN_Pretrain.forward
# ----------------------------------------------------------------------------
@functools.partial(jax.jit, static_argnames=("c_in", "c_mid", "embed", "hidden"))
def _forward_pair(slab, x1, x2, *, c_in, c_mid, embed, hidden):
    n, c, h, w = x1.shape
    assert c == c_in and x2.shape == x1.shape
    hw = h * w
    # Free reshapes (trailing-dim merge of contiguous NCHW): no XLA data movement.
    x1r = x1.astype(jnp.float32).reshape(n, c, hw)
    x2r = x2.astype(jnp.float32).reshape(n, c, hw)

    kern = functools.partial(_fused_pair_kernel, n=n, c_in=c_in, c_mid=c_mid,
                             h=h, w=w, embed=embed, hidden=hidden)
    vmem = pl.BlockSpec(memory_space=pltpu.MemorySpace.VMEM)
    out = jax.ShapeDtypeStruct((n, embed), jnp.float32)
    f1, g1, f2, g2 = pl.pallas_call(
        kern,
        out_shape=(out, out, out, out),
        in_specs=[vmem, vmem, vmem],
        out_specs=(vmem, vmem, vmem, vmem),
    )(x1r, x2r, slab)
    return (f1, f2), (g1, g2)


def mcrn_pretrain_forward(packed, img=None, text=None, audio=None):
    """Mirrors MCRN_Pretrain.forward."""
    dims = packed["dims"]
    if img is not None:
        x1, x2 = img
        (f1, f2), (g1, g2) = _forward_pair(packed["slab"], x1, x2, **dims)
        return ([f1, f2], [g1, g2])
    elif text is not None:
        # TODO(synk): MCRN_text (embedding/GRU) definition not provided; text branch not implemented.
        return None
    elif audio is not None:
        # The PyTorch reference routes audio through self.visual as well.
        x1, x2 = audio
        (f1, f2), (g1, g2) = _forward_pair(packed["slab"], x1, x2, **dims)
        return ([f1, f2], [g1, g2])
    else:
        return None


# ----------------------------------------------------------------------------
# Pure-JAX reference (correctness check)
# ----------------------------------------------------------------------------
def _reference_pair(params, x1, x2):
    vp, sp = params["visual"], params["share"]
    hi = jax.lax.Precision.HIGHEST

    def enc(x):
        y = jax.lax.conv_general_dilated(
            x.astype(jnp.float32), vp["conv_w"],
            window_strides=(1, 1), padding=((1, 1), (1, 1)),
            dimension_numbers=("NCHW", "OIHW", "NCHW"), precision=hi)
        y = jnp.maximum(y + vp["conv_b"][None, :, None, None], 0.0)
        pooled = jnp.mean(y, axis=(2, 3))
        f = jnp.dot(pooled, vp["fc_w"], precision=hi) + vp["fc_b"]
        f = f / jnp.maximum(jnp.linalg.norm(f, axis=-1, keepdims=True), 1e-12)
        h = jnp.maximum(jnp.dot(f, sp["w1"], precision=hi) + sp["b1"], 0.0)
        g = jnp.dot(h, sp["w2"], precision=hi) + sp["b2"]
        g = g / jnp.maximum(jnp.linalg.norm(g, axis=-1, keepdims=True), 1e-12)
        return f, g

    f1, g1 = enc(x1)
    f2, g2 = enc(x2)
    return [f1, f2], [g1, g2]


# ----------------------------------------------------------------------------
if __name__ == "__main__":
    key = jax.random.PRNGKey(0)
    kp, k1, k2 = jax.random.split(key, 3)

    params = init_params(kp, c_in=4, c_mid=8, embed=32, hidden=32)
    packed = prepack_params(params)

    # Small NCHW inputs: batch=2, channels=4, spatial=16x16
    img1 = jax.random.normal(k1, (2, 4, 16, 16), jnp.float32)
    img2 = jax.random.normal(k2, (2, 4, 16, 16), jnp.float32)

    fvs, gvs = mcrn_pretrain_forward(packed, img=(img1, img2))
    for t in fvs + gvs:
        jax.block_until_ready(t)

    assert fvs[0].shape == (2, 32) and fvs[1].shape == (2, 32)
    assert gvs[0].shape == (2, 32) and gvs[1].shape == (2, 32)

    # Numerical check against the pure-JAX reference (tolerance absorbs MXU
    # default-precision vs HIGHEST; real layout/tap-ordering bugs would give
    # O(0.1) errors).
    rf, rg = _reference_pair(params, img1, img2)
    for got, want in zip(fvs + gvs, rf + rg):
        err = float(jnp.max(jnp.abs(got - want)))
        assert err < 2e-2, f"mismatch vs reference: max abs err = {err}"

    print("KERNEL_OK")
</pallas_src>

<mosaic_0001>
module attributes {stable_mosaic.version = 11 : i64} {
  func.func @_fused_pair_kernel(%arg0: memref<2x4x256xf32, #tpu.memory_space<vmem>>, %arg1: memref<2x4x256xf32, #tpu.memory_space<vmem>>, %arg2: memref<176x32xf32, #tpu.memory_space<vmem>>, %arg3: memref<2x32xf32, #tpu.memory_space<vmem>>, %arg4: memref<2x32xf32, #tpu.memory_space<vmem>>, %arg5: memref<2x32xf32, #tpu.memory_space<vmem>>, %arg6: memref<2x32xf32, #tpu.memory_space<vmem>>) attributes {dimension_semantics = [], scalar_prefetch = 0 : i64, scratch_operands = 0 : i64, tpu.core_type = #tpu.core_type<tc>} {
    %c0 = arith.constant 0 : index
    %c0_0 = arith.constant 0 : index
    %0 = vector.load %arg2[%c0, %c0_0] : memref<176x32xf32, #tpu.memory_space<vmem>>, vector<8x4xf32>
    %c8 = arith.constant 8 : index
    %c0_1 = arith.constant 0 : index
    %1 = vector.load %arg2[%c8, %c0_1] : memref<176x32xf32, #tpu.memory_space<vmem>>, vector<8x4xf32>
    %c16 = arith.constant 16 : index
    %c0_2 = arith.constant 0 : index
    %2 = vector.load %arg2[%c16, %c0_2] : memref<176x32xf32, #tpu.memory_space<vmem>>, vector<8x4xf32>
    %c24 = arith.constant 24 : index
    %c0_3 = arith.constant 0 : index
    %3 = vector.load %arg2[%c24, %c0_3] : memref<176x32xf32, #tpu.memory_space<vmem>>, vector<8x4xf32>
    %c32 = arith.constant 32 : index
    %c0_4 = arith.constant 0 : index
    %4 = vector.load %arg2[%c32, %c0_4] : memref<176x32xf32, #tpu.memory_space<vmem>>, vector<8x4xf32>
    %c40 = arith.constant 40 : index
    %c0_5 = arith.constant 0 : index
    %5 = vector.load %arg2[%c40, %c0_5] : memref<176x32xf32, #tpu.memory_space<vmem>>, vector<8x4xf32>
    %c48 = arith.constant 48 : index
    %c0_6 = arith.constant 0 : index
    %6 = vector.load %arg2[%c48, %c0_6] : memref<176x32xf32, #tpu.memory_space<vmem>>, vector<8x4xf32>
    %c56 = arith.constant 56 : index
    %c0_7 = arith.constant 0 : index
    %7 = vector.load %arg2[%c56, %c0_7] : memref<176x32xf32, #tpu.memory_space<vmem>>, vector<8x4xf32>
    %c64 = arith.constant 64 : index
    %c0_8 = arith.constant 0 : index
    %8 = vector.load %arg2[%c64, %c0_8] : memref<176x32xf32, #tpu.memory_space<vmem>>, vector<8x4xf32>
    %c72 = arith.constant 72 : index
    %c0_9 = arith.constant 0 : index
    %9 = vector.load %arg2[%c72, %c0_9] : memref<176x32xf32, #tpu.memory_space<vmem>>, vector<8x1xf32>
    %c80 = arith.constant 80 : index
    %c0_10 = arith.constant 0 : index
    %10 = vector.load %arg2[%c80, %c0_10] : memref<176x32xf32, #tpu.memory_space<vmem>>, vector<8x32xf32>
    %c88 = arith.constant 88 : index
    %c0_11 = arith.constant 0 : index
    %11 = vector.load %arg2[%c88, %c0_11] : memref<176x32xf32, #tpu.memory_space<vmem>>, vector<32x32xf32>
    %c120 = arith.constant 120 : index
    %c0_12 = arith.constant 0 : index
    %12 = vector.load %arg2[%c120, %c0_12] : memref<176x32xf32, #tpu.memory_space<vmem>>, vector<32x32xf32>
    %c152 = arith.constant 152 : index
    %c0_13 = arith.constant 0 : index
    %13 = vector.load %arg2[%c152, %c0_13] : memref<176x32xf32, #tpu.memory_space<vmem>>, vector<1x32xf32>
    %c160 = arith.constant 160 : index
    %c0_14 = arith.constant 0 : index
    %14 = vector.load %arg2[%c160, %c0_14] : memref<176x32xf32, #tpu.memory_space<vmem>>, vector<1x32xf32>
    %c168 = arith.constant 168 : index
    %c0_15 = arith.constant 0 : index
    %15 = vector.load %arg2[%c168, %c0_15] : memref<176x32xf32, #tpu.memory_space<vmem>>, vector<1x32xf32>
    %16 = tpu.iota {dimensions = array<i32: 1>} : vector<1x256xi32>
    %c4_i32 = arith.constant 4 : i32
    %17 = vector.broadcast %c4_i32 : i32 to vector<1x256xi32>
    %18 = arith.shrsi %16, %17 : vector<1x256xi32>
    %c15_i32 = arith.constant 15 : i32
    %19 = vector.broadcast %c15_i32 : i32 to vector<1x256xi32>
    %20 = arith.andi %16, %19 : vector<1x256xi32>
    %c1_i32 = arith.constant 1 : i32
    %21 = vector.broadcast %c1_i32 : i32 to vector<1x256xi32>
    %22 = arith.cmpi sge, %18, %21 : vector<1x256xi32>
    %c1_i32_16 = arith.constant 1 : i32
    %23 = vector.broadcast %c1_i32_16 : i32 to vector<1x256xi32>
    %24 = arith.cmpi sge, %20, %23 : vector<1x256xi32>
    %25 = arith.andi %22, %24 : vector<1x256xi1>
    %c1_i32_17 = arith.constant 1 : i32
    %26 = vector.broadcast %c1_i32_17 : i32 to vector<1x256xi32>
    %27 = arith.cmpi sge, %18, %26 : vector<1x256xi32>
    %c1_i32_18 = arith.constant 1 : i32
    %28 = vector.broadcast %c1_i32_18 : i32 to vector<1x256xi32>
    %29 = arith.cmpi sge, %18, %28 : vector<1x256xi32>
    %c15_i32_19 = arith.constant 15 : i32
    %30 = vector.broadcast %c15_i32_19 : i32 to vector<1x256xi32>
    %31 = arith.cmpi slt, %20, %30 : vector<1x256xi32>
    %32 = arith.andi %29, %31 : vector<1x256xi1>
    %c1_i32_20 = arith.constant 1 : i32
    %33 = vector.broadcast %c1_i32_20 : i32 to vector<1x256xi32>
    %34 = arith.cmpi sge, %20, %33 : vector<1x256xi32>
    %c15_i32_21 = arith.constant 15 : i32
    %35 = vector.broadcast %c15_i32_21 : i32 to vector<1x256xi32>
    %36 = arith.cmpi slt, %20, %35 : vector<1x256xi32>
    %c15_i32_22 = arith.constant 15 : i32
    %37 = vector.broadcast %c15_i32_22 : i32 to vector<1x256xi32>
    %38 = arith.cmpi slt, %18, %37 : vector<1x256xi32>
    %c1_i32_23 = arith.constant 1 : i32
    %39 = vector.broadcast %c1_i32_23 : i32 to vector<1x256xi32>
    %40 = arith.cmpi sge, %20, %39 : vector<1x256xi32>
    %41 = arith.andi %38, %40 : vector<1x256xi1>
    %c15_i32_24 = arith.constant 15 : i32
    %42 = vector.broadcast %c15_i32_24 : i32 to vector<1x256xi32>
    %43 = arith.cmpi slt, %18, %42 : vector<1x256xi32>
    %c15_i32_25 = arith.constant 15 : i32
    %44 = vector.broadcast %c15_i32_25 : i32 to vector<1x256xi32>
    %45 = arith.cmpi slt, %18, %44 : vector<1x256xi32>
    %c15_i32_26 = arith.constant 15 : i32
    %46 = vector.broadcast %c15_i32_26 : i32 to vector<1x256xi32>
    %47 = arith.cmpi slt, %20, %46 : vector<1x256xi32>
    %48 = arith.andi %45, %47 : vector<1x256xi1>
    %c0_27 = arith.constant 0 : index
    %c0_28 = arith.constant 0 : index
    %c0_29 = arith.constant 0 : index
    %49 = vector.load %arg0[%c0_27, %c0_28, %c0_29] : memref<2x4x256xf32, #tpu.memory_space<vmem>>, vector<1x4x256xf32>
    %50 = vector.shape_cast %49 : vector<1x4x256xf32> to vector<4x256xf32>
    %c17_i32 = arith.constant 17 : i32
    %51 = tpu.dynamic_rotate %50 by %c17_i32 dim 1 : vector<4x256xf32>, i32 -> vector<4x256xf32>
    %cst = arith.constant 0.000000e+00 : f32
    %52 = vector.shape_cast %25 : vector<1x256xi1> to vector<1x256xi1>
    %53 = vector.broadcast %52 : vector<1x256xi1> to vector<4x256xi1>
    %54 = vector.broadcast %cst : f32 to vector<4x256xf32>
    %55 = arith.select %53, %51, %54 : vector<4x256xi1>, vector<4x256xf32>
    %cst_30 = arith.constant dense<0.000000e+00> : vector<8x256xf32>
    %56 = tpu.matmul %0, %55, %cst_30 {dimension_numbers = #tpu.dot_dimension_numbers<[1], [0], [0], [1], [0, 0, 1, 1], [], []>} : vector<8x4xf32>, vector<4x256xf32>, vector<8x256xf32> -> vector<8x256xf32>
    %c16_i32 = arith.constant 16 : i32
    %57 = tpu.dynamic_rotate %50 by %c16_i32 dim 1 : vector<4x256xf32>, i32 -> vector<4x256xf32>
    %cst_31 = arith.constant 0.000000e+00 : f32
    %58 = vector.shape_cast %27 : vector<1x256xi1> to vector<1x256xi1>
    %59 = vector.broadcast %58 : vector<1x256xi1> to vector<4x256xi1>
    %60 = vector.broadcast %cst_31 : f32 to vector<4x256xf32>
    %61 = arith.select %59, %57, %60 : vector<4x256xi1>, vector<4x256xf32>
    %cst_32 = arith.constant dense<0.000000e+00> : vector<8x256xf32>
    %62 = tpu.matmul %1, %61, %cst_32 {dimension_numbers = #tpu.dot_dimension_numbers<[1], [0], [0], [1], [0, 0, 1, 1], [], []>} : vector<8x4xf32>, vector<4x256xf32>, vector<8x256xf32> -> vector<8x256xf32>
    %63 = arith.addf %56, %62 : vector<8x256xf32>
    %c15_i32_33 = arith.constant 15 : i32
    %64 = tpu.dynamic_rotate %50 by %c15_i32_33 dim 1 : vector<4x256xf32>, i32 -> vector<4x256xf32>
    %cst_34 = arith.constant 0.000000e+00 : f32
    %65 = vector.shape_cast %32 : vector<1x256xi1> to vector<1x256xi1>
    %66 = vector.broadcast %65 : vector<1x256xi1> to vector<4x256xi1>
    %67 = vector.broadcast %cst_34 : f32 to vector<4x256xf32>
    %68 = arith.select %66, %64, %67 : vector<4x256xi1>, vector<4x256xf32>
    %cst_35 = arith.constant dense<0.000000e+00> : vector<8x256xf32>
    %69 = tpu.matmul %2, %68, %cst_35 {dimension_numbers = #tpu.dot_dimension_numbers<[1], [0], [0], [1], [0, 0, 1, 1], [], []>} : vector<8x4xf32>, vector<4x256xf32>, vector<8x256xf32> -> vector<8x256xf32>
    %70 = arith.addf %63, %69 : vector<8x256xf32>
    %c1_i32_36 = arith.constant 1 : i32
    %71 = tpu.dynamic_rotate %50 by %c1_i32_36 dim 1 : vector<4x256xf32>, i32 -> vector<4x256xf32>
    %cst_37 = arith.constant 0.000000e+00 : f32
    %72 = vector.shape_cast %34 : vector<1x256xi1> to vector<1x256xi1>
    %73 = vector.broadcast %72 : vector<1x256xi1> to vector<4x256xi1>
    %74 = vector.broadcast %cst_37 : f32 to vector<4x256xf32>
    %75 = arith.select %73, %71, %74 : vector<4x256xi1>, vector<4x256xf32>
    %cst_38 = arith.constant dense<0.000000e+00> : vector<8x256xf32>
    %76 = tpu.matmul %3, %75, %cst_38 {dimension_numbers = #tpu.dot_dimension_numbers<[1], [0], [0], [1], [0, 0, 1, 1], [], []>} : vector<8x4xf32>, vector<4x256xf32>, vector<8x256xf32> -> vector<8x256xf32>
    %77 = arith.addf %70, %76 : vector<8x256xf32>
    %cst_39 = arith.constant dense<0.000000e+00> : vector<8x256xf32>
    %78 = tpu.matmul %4, %50, %cst_39 {dimension_numbers = #tpu.dot_dimension_numbers<[1], [0], [0], [1], [0, 0, 1, 1], [], []>} : vector<8x4xf32>, vector<4x256xf32>, vector<8x256xf32> -> vector<8x256xf32>
    %79 = arith.addf %77, %78 : vector<8x256xf32>
    %c255_i32 = arith.constant 255 : i32
    %80 = tpu.dynamic_rotate %50 by %c255_i32 dim 1 : vector<4x256xf32>, i32 -> vector<4x256xf32>
    %cst_40 = arith.constant 0.000000e+00 : f32
    %81 = vector.shape_cast %36 : vector<1x256xi1> to vector<1x256xi1>
    %82 = vector.broadcast %81 : vector<1x256xi1> to vector<4x256xi1>
    %83 = vector.broadcast %cst_40 : f32 to vector<4x256xf32>
    %84 = arith.select %82, %80, %83 : vector<4x256xi1>, vector<4x256xf32>
    %cst_41 = arith.constant dense<0.000000e+00> : vector<8x256xf32>
    %85 = tpu.matmul %5, %84, %cst_41 {dimension_numbers = #tpu.dot_dimension_numbers<[1], [0], [0], [1], [0, 0, 1, 1], [], []>} : vector<8x4xf32>, vector<4x256xf32>, vector<8x256xf32> -> vector<8x256xf32>
    %86 = arith.addf %79, %85 : vector<8x256xf32>
    %c241_i32 = arith.constant 241 : i32
    %87 = tpu.dynamic_rotate %50 by %c241_i32 dim 1 : vector<4x256xf32>, i32 -> vector<4x256xf32>
    %cst_42 = arith.constant 0.000000e+00 : f32
    %88 = vector.shape_cast %41 : vector<1x256xi1> to vector<1x256xi1>
    %89 = vector.broadcast %88 : vector<1x256xi1> to vector<4x256xi1>
    %90 = vector.broadcast %cst_42 : f32 to vector<4x256xf32>
    %91 = arith.select %89, %87, %90 : vector<4x256xi1>, vector<4x256xf32>
    %cst_43 = arith.constant dense<0.000000e+00> : vector<8x256xf32>
    %92 = tpu.matmul %6, %91, %cst_43 {dimension_numbers = #tpu.dot_dimension_numbers<[1], [0], [0], [1], [0, 0, 1, 1], [], []>} : vector<8x4xf32>, vector<4x256xf32>, vector<8x256xf32> -> vector<8x256xf32>
    %93 = arith.addf %86, %92 : vector<8x256xf32>
    %c240_i32 = arith.constant 240 : i32
    %94 = tpu.dynamic_rotate %50 by %c240_i32 dim 1 : vector<4x256xf32>, i32 -> vector<4x256xf32>
    %cst_44 = arith.constant 0.000000e+00 : f32
    %95 = vector.shape_cast %43 : vector<1x256xi1> to vector<1x256xi1>
    %96 = vector.broadcast %95 : vector<1x256xi1> to vector<4x256xi1>
    %97 = vector.broadcast %cst_44 : f32 to vector<4x256xf32>
    %98 = arith.select %96, %94, %97 : vector<4x256xi1>, vector<4x256xf32>
    %cst_45 = arith.constant dense<0.000000e+00> : vector<8x256xf32>
    %99 = tpu.matmul %7, %98, %cst_45 {dimension_numbers = #tpu.dot_dimension_numbers<[1], [0], [0], [1], [0, 0, 1, 1], [], []>} : vector<8x4xf32>, vector<4x256xf32>, vector<8x256xf32> -> vector<8x256xf32>
    %100 = arith.addf %93, %99 : vector<8x256xf32>
    %c239_i32 = arith.constant 239 : i32
    %101 = tpu.dynamic_rotate %50 by %c239_i32 dim 1 : vector<4x256xf32>, i32 -> vector<4x256xf32>
    %cst_46 = arith.constant 0.000000e+00 : f32
    %102 = vector.shape_cast %48 : vector<1x256xi1> to vector<1x256xi1>
    %103 = vector.broadcast %102 : vector<1x256xi1> to vector<4x256xi1>
    %104 = vector.broadcast %cst_46 : f32 to vector<4x256xf32>
    %105 = arith.select %103, %101, %104 : vector<4x256xi1>, vector<4x256xf32>
    %cst_47 = arith.constant dense<0.000000e+00> : vector<8x256xf32>
    %106 = tpu.matmul %8, %105, %cst_47 {dimension_numbers = #tpu.dot_dimension_numbers<[1], [0], [0], [1], [0, 0, 1, 1], [], []>} : vector<8x4xf32>, vector<4x256xf32>, vector<8x256xf32> -> vector<8x256xf32>
    %107 = arith.addf %100, %106 : vector<8x256xf32>
    %108 = vector.broadcast %9 : vector<8x1xf32> to vector<8x256xf32>
    %109 = arith.addf %107, %108 : vector<8x256xf32>
    %cst_48 = arith.constant 0.000000e+00 : f32
    %110 = vector.broadcast %cst_48 : f32 to vector<8x256xf32>
    %111 = arith.maximumf %109, %110 : vector<8x256xf32>
    %cst_49 = arith.constant dense<0.000000e+00> : vector<8xf32>
    %112 = vector.multi_reduction <add>, %111, %cst_49 [1] : vector<8x256xf32> to vector<8xf32>
    %113 = vector.shape_cast %112 : vector<8xf32> to vector<8x1xf32>
    %cst_50 = arith.constant 3.906250e-03 : f32
    %114 = vector.broadcast %cst_50 : f32 to vector<8x1xf32>
    %115 = arith.mulf %113, %114 : vector<8x1xf32>
    %116 = vector.broadcast %115 : vector<8x1xf32> to vector<8x32xf32>
    %117 = arith.mulf %116, %10 : vector<8x32xf32>
    %cst_51 = arith.constant dense<0.000000e+00> : vector<32xf32>
    %118 = vector.multi_reduction <add>, %117, %cst_51 [0] : vector<8x32xf32> to vector<32xf32>
    %119 = vector.shape_cast %118 : vector<32xf32> to vector<1x32xf32>
    %120 = arith.addf %119, %13 : vector<1x32xf32>
    %121 = arith.mulf %120, %120 : vector<1x32xf32>
    %cst_52 = arith.constant dense<0.000000e+00> : vector<1xf32>
    %122 = vector.multi_reduction <add>, %121, %cst_52 [1] : vector<1x32xf32> to vector<1xf32>
    %123 = vector.shape_cast %122 : vector<1xf32> to vector<1x1xf32>
    %cst_53 = arith.constant 1.000000e-24 : f32
    %124 = vector.broadcast %cst_53 : f32 to vector<1x1xf32>
    %125 = arith.maximumf %123, %124 : vector<1x1xf32>
    %126 = math.rsqrt %125 : vector<1x1xf32>
    %127 = vector.broadcast %126 : vector<1x1xf32> to vector<1x32xf32>
    %128 = arith.mulf %120, %127 : vector<1x32xf32>
    %c0_54 = arith.constant 0 : index
    %c0_55 = arith.constant 0 : index
    %129 = vector.load %arg3[%c0_54, %c0_55] : memref<2x32xf32, #tpu.memory_space<vmem>>, vector<1x32xf32>
    tpu.vector_store %arg3[%c0_54, %c0_55], %128 {strides = array<i32>} : memref<2x32xf32, #tpu.memory_space<vmem>>, vector<1x32xf32>,
    %c1 = arith.constant 1 : index
    %c0_56 = arith.constant 0 : index
    %c0_57 = arith.constant 0 : index
    %130 = vector.load %arg0[%c1, %c0_56, %c0_57] : memref<2x4x256xf32, #tpu.memory_space<vmem>>, vector<1x4x256xf32>
    %131 = vector.shape_cast %130 : vector<1x4x256xf32> to vector<4x256xf32>
    %c17_i32_58 = arith.constant 17 : i32
    %132 = tpu.dynamic_rotate %131 by %c17_i32_58 dim 1 : vector<4x256xf32>, i32 -> vector<4x256xf32>
    %cst_59 = arith.constant 0.000000e+00 : f32
    %133 = vector.shape_cast %25 : vector<1x256xi1> to vector<1x256xi1>
    %134 = vector.broadcast %133 : vector<1x256xi1> to vector<4x256xi1>
    %135 = vector.broadcast %cst_59 : f32 to vector<4x256xf32>
    %136 = arith.select %134, %132, %135 : vector<4x256xi1>, vector<4x256xf32>
    %cst_60 = arith.constant dense<0.000000e+00> : vector<8x256xf32>
    %137 = tpu.matmul %0, %136, %cst_60 {dimension_numbers = #tpu.dot_dimension_numbers<[1], [0], [0], [1], [0, 0, 1, 1], [], []>} : vector<8x4xf32>, vector<4x256xf32>, vector<8x256xf32> -> vector<8x256xf32>
    %c16_i32_61 = arith.constant 16 : i32
    %138 = tpu.dynamic_rotate %131 by %c16_i32_61 dim 1 : vector<4x256xf32>, i32 -> vector<4x256xf32>
    %cst_62 = arith.constant 0.000000e+00 : f32
    %139 = vector.shape_cast %27 : vector<1x256xi1> to vector<1x256xi1>
    %140 = vector.broadcast %139 : vector<1x256xi1> to vector<4x256xi1>
    %141 = vector.broadcast %cst_62 : f32 to vector<4x256xf32>
    %142 = arith.select %140, %138, %141 : vector<4x256xi1>, vector<4x256xf32>
    %cst_63 = arith.constant dense<0.000000e+00> : vector<8x256xf32>
    %143 = tpu.matmul %1, %142, %cst_63 {dimension_numbers = #tpu.dot_dimension_numbers<[1], [0], [0], [1], [0, 0, 1, 1], [], []>} : vector<8x4xf32>, vector<4x256xf32>, vector<8x256xf32> -> vector<8x256xf32>
    %144 = arith.addf %137, %143 : vector<8x256xf32>
    %c15_i32_64 = arith.constant 15 : i32
    %145 = tpu.dynamic_rotate %131 by %c15_i32_64 dim 1 : vector<4x256xf32>, i32 -> vector<4x256xf32>
    %cst_65 = arith.constant 0.000000e+00 : f32
    %146 = vector.shape_cast %32 : vector<1x256xi1> to vector<1x256xi1>
    %147 = vector.broadcast %146 : vector<1x256xi1> to vector<4x256xi1>
    %148 = vector.broadcast %cst_65 : f32 to vector<4x256xf32>
    %149 = arith.select %147, %145, %148 : vector<4x256xi1>, vector<4x256xf32>
    %cst_66 = arith.constant dense<0.000000e+00> : vector<8x256xf32>
    %150 = tpu.matmul %2, %149, %cst_66 {dimension_numbers = #tpu.dot_dimension_numbers<[1], [0], [0], [1], [0, 0, 1, 1], [], []>} : vector<8x4xf32>, vector<4x256xf32>, vector<8x256xf32> -> vector<8x256xf32>
    %151 = arith.addf %144, %150 : vector<8x256xf32>
    %c1_i32_67 = arith.constant 1 : i32
    %152 = tpu.dynamic_rotate %131 by %c1_i32_67 dim 1 : vector<4x256xf32>, i32 -> vector<4x256xf32>
    %cst_68 = arith.constant 0.000000e+00 : f32
    %153 = vector.shape_cast %34 : vector<1x256xi1> to vector<1x256xi1>
    %154 = vector.broadcast %153 : vector<1x256xi1> to vector<4x256xi1>
    %155 = vector.broadcast %cst_68 : f32 to vector<4x256xf32>
    %156 = arith.select %154, %152, %155 : vector<4x256xi1>, vector<4x256xf32>
    %cst_69 = arith.constant dense<0.000000e+00> : vector<8x256xf32>
    %157 = tpu.matmul %3, %156, %cst_69 {dimension_numbers = #tpu.dot_dimension_numbers<[1], [0], [0], [1], [0, 0, 1, 1], [], []>} : vector<8x4xf32>, vector<4x256xf32>, vector<8x256xf32> -> vector<8x256xf32>
    %158 = arith.addf %151, %157 : vector<8x256xf32>
    %cst_70 = arith.constant dense<0.000000e+00> : vector<8x256xf32>
    %159 = tpu.matmul %4, %131, %cst_70 {dimension_numbers = #tpu.dot_dimension_numbers<[1], [0], [0], [1], [0, 0, 1, 1], [], []>} : vector<8x4xf32>, vector<4x256xf32>, vector<8x256xf32> -> vector<8x256xf32>
    %160 = arith.addf %158, %159 : vector<8x256xf32>
    %c255_i32_71 = arith.constant 255 : i32
    %161 = tpu.dynamic_rotate %131 by %c255_i32_71 dim 1 : vector<4x256xf32>, i32 -> vector<4x256xf32>
    %cst_72 = arith.constant 0.000000e+00 : f32
    %162 = vector.shape_cast %36 : vector<1x256xi1> to vector<1x256xi1>
    %163 = vector.broadcast %162 : vector<1x256xi1> to vector<4x256xi1>
    %164 = vector.broadcast %cst_72 : f32 to vector<4x256xf32>
    %165 = arith.select %163, %161, %164 : vector<4x256xi1>, vector<4x256xf32>
    %cst_73 = arith.constant dense<0.000000e+00> : vector<8x256xf32>
    %166 = tpu.matmul %5, %165, %cst_73 {dimension_numbers = #tpu.dot_dimension_numbers<[1], [0], [0], [1], [0, 0, 1, 1], [], []>} : vector<8x4xf32>, vector<4x256xf32>, vector<8x256xf32> -> vector<8x256xf32>
    %167 = arith.addf %160, %166 : vector<8x256xf32>
    %c241_i32_74 = arith.constant 241 : i32
    %168 = tpu.dynamic_rotate %131 by %c241_i32_74 dim 1 : vector<4x256xf32>, i32 -> vector<4x256xf32>
    %cst_75 = arith.constant 0.000000e+00 : f32
    %169 = vector.shape_cast %41 : vector<1x256xi1> to vector<1x256xi1>
    %170 = vector.broadcast %169 : vector<1x256xi1> to vector<4x256xi1>
    %171 = vector.broadcast %cst_75 : f32 to vector<4x256xf32>
    %172 = arith.select %170, %168, %171 : vector<4x256xi1>, vector<4x256xf32>
    %cst_76 = arith.constant dense<0.000000e+00> : vector<8x256xf32>
    %173 = tpu.matmul %6, %172, %cst_76 {dimension_numbers = #tpu.dot_dimension_numbers<[1], [0], [0], [1], [0, 0, 1, 1], [], []>} : vector<8x4xf32>, vector<4x256xf32>, vector<8x256xf32> -> vector<8x256xf32>
    %174 = arith.addf %167, %173 : vector<8x256xf32>
    %c240_i32_77 = arith.constant 240 : i32
    %175 = tpu.dynamic_rotate %131 by %c240_i32_77 dim 1 : vector<4x256xf32>, i32 -> vector<4x256xf32>
    %cst_78 = arith.constant 0.000000e+00 : f32
    %176 = vector.shape_cast %43 : vector<1x256xi1> to vector<1x256xi1>
    %177 = vector.broadcast %176 : vector<1x256xi1> to vector<4x256xi1>
    %178 = vector.broadcast %cst_78 : f32 to vector<4x256xf32>
    %179 = arith.select %177, %175, %178 : vector<4x256xi1>, vector<4x256xf32>
    %cst_79 = arith.constant dense<0.000000e+00> : vector<8x256xf32>
    %180 = tpu.matmul %7, %179, %cst_79 {dimension_numbers = #tpu.dot_dimension_numbers<[1], [0], [0], [1], [0, 0, 1, 1], [], []>} : vector<8x4xf32>, vector<4x256xf32>, vector<8x256xf32> -> vector<8x256xf32>
    %181 = arith.addf %174, %180 : vector<8x256xf32>
    %c239_i32_80 = arith.constant 239 : i32
    %182 = tpu.dynamic_rotate %131 by %c239_i32_80 dim 1 : vector<4x256xf32>, i32 -> vector<4x256xf32>
    %cst_81 = arith.constant 0.000000e+00 : f32
    %183 = vector.shape_cast %48 : vector<1x256xi1> to vector<1x256xi1>
    %184 = vector.broadcast %183 : vector<1x256xi1> to vector<4x256xi1>
    %185 = vector.broadcast %cst_81 : f32 to vector<4x256xf32>
    %186 = arith.select %184, %182, %185 : vector<4x256xi1>, vector<4x256xf32>
    %cst_82 = arith.constant dense<0.000000e+00> : vector<8x256xf32>
    %187 = tpu.matmul %8, %186, %cst_82 {dimension_numbers = #tpu.dot_dimension_numbers<[1], [0], [0], [1], [0, 0, 1, 1], [], []>} : vector<8x4xf32>, vector<4x256xf32>, vector<8x256xf32> -> vector<8x256xf32>
    %188 = arith.addf %181, %187 : vector<8x256xf32>
    %189 = vector.broadcast %9 : vector<8x1xf32> to vector<8x256xf32>
    %190 = arith.addf %188, %189 : vector<8x256xf32>
    %cst_83 = arith.constant 0.000000e+00 : f32
    %191 = vector.broadcast %cst_83 : f32 to vector<8x256xf32>
    %192 = arith.maximumf %190, %191 : vector<8x256xf32>
    %cst_84 = arith.constant dense<0.000000e+00> : vector<8xf32>
    %193 = vector.multi_reduction <add>, %192, %cst_84 [1] : vector<8x256xf32> to vector<8xf32>
    %194 = vector.shape_cast %193 : vector<8xf32> to vector<8x1xf32>
    %cst_85 = arith.constant 3.906250e-03 : f32
    %195 = vector.broadcast %cst_85 : f32 to vector<8x1xf32>
    %196 = arith.mulf %194, %195 : vector<8x1xf32>
    %197 = vector.broadcast %196 : vector<8x1xf32> to vector<8x32xf32>
    %198 = arith.mulf %197, %10 : vector<8x32xf32>
    %cst_86 = arith.constant dense<0.000000e+00> : vector<32xf32>
    %199 = vector.multi_reduction <add>, %198, %cst_86 [0] : vector<8x32xf32> to vector<32xf32>
    %200 = vector.shape_cast %199 : vector<32xf32> to vector<1x32xf32>
    %201 = arith.addf %200, %13 : vector<1x32xf32>
    %202 = arith.mulf %201, %201 : vector<1x32xf32>
    %cst_87 = arith.constant dense<0.000000e+00> : vector<1xf32>
    %203 = vector.multi_reduction <add>, %202, %cst_87 [1] : vector<1x32xf32> to vector<1xf32>
    %204 = vector.shape_cast %203 : vector<1xf32> to vector<1x1xf32>
    %cst_88 = arith.constant 1.000000e-24 : f32
    %205 = vector.broadcast %cst_88 : f32 to vector<1x1xf32>
    %206 = arith.maximumf %204, %205 : vector<1x1xf32>
    %207 = math.rsqrt %206 : vector<1x1xf32>
    %208 = vector.broadcast %207 : vector<1x1xf32> to vector<1x32xf32>
    %209 = arith.mulf %201, %208 : vector<1x32xf32>
    %c1_89 = arith.constant 1 : index
    %c0_90 = arith.constant 0 : index
    %210 = vector.load %arg3[%c1_89, %c0_90] : memref<2x32xf32, #tpu.memory_space<vmem>>, vector<1x32xf32>
    tpu.vector_store %arg3[%c1_89, %c0_90], %209 {strides = array<i32>} : memref<2x32xf32, #tpu.memory_space<vmem>>, vector<1x32xf32>,
    %c0_91 = arith.constant 0 : index
    %c0_92 = arith.constant 0 : index
    %211 = vector.load %arg3[%c0_91, %c0_92] : memref<2x32xf32, #tpu.memory_space<vmem>>, vector<2x32xf32>
    %cst_93 = arith.constant dense<0.000000e+00> : vector<2x32xf32>
    %212 = tpu.matmul %211, %11, %cst_93 {dimension_numbers = #tpu.dot_dimension_numbers<[1], [0], [0], [1], [0, 0, 1, 1], [], []>} : vector<2x32xf32>, vector<32x32xf32>, vector<2x32xf32> -> vector<2x32xf32>
    %213 = vector.broadcast %14 : vector<1x32xf32> to vector<2x32xf32>
    %214 = arith.addf %212, %213 : vector<2x32xf32>
    %cst_94 = arith.constant 0.000000e+00 : f32
    %215 = vector.broadcast %cst_94 : f32 to vector<2x32xf32>
    %216 = arith.maximumf %214, %215 : vector<2x32xf32>
    %cst_95 = arith.constant dense<0.000000e+00> : vector<2x32xf32>
    %217 = tpu.matmul %216, %12, %cst_95 {dimension_numbers = #tpu.dot_dimension_numbers<[1], [0], [0], [1], [0, 0, 1, 1], [], []>} : vector<2x32xf32>, vector<32x32xf32>, vector<2x32xf32> -> vector<2x32xf32>
    %218 = vector.broadcast %15 : vector<1x32xf32> to vector<2x32xf32>
    %219 = arith.addf %217, %218 : vector<2x32xf32>
    %220 = arith.mulf %219, %219 : vector<2x32xf32>
    %cst_96 = arith.constant dense<0.000000e+00> : vector<2xf32>
    %221 = vector.multi_reduction <add>, %220, %cst_96 [1] : vector<2x32xf32> to vector<2xf32>
    %222 = vector.shape_cast %221 : vector<2xf32> to vector<2x1xf32>
    %cst_97 = arith.constant 1.000000e-24 : f32
    %223 = vector.broadcast %cst_97 : f32 to vector<2x1xf32>
    %224 = arith.maximumf %222, %223 : vector<2x1xf32>
    %225 = math.rsqrt %224 : vector<2x1xf32>
    %226 = vector.broadcast %225 : vector<2x1xf32> to vector<2x32xf32>
    %227 = arith.mulf %219, %226 : vector<2x32xf32>
    %c0_98 = arith.constant 0 : index
    %c0_99 = arith.constant 0 : index
    %228 = vector.load %arg4[%c0_98, %c0_99] : memref<2x32xf32, #tpu.memory_space<vmem>>, vector<2x32xf32>
    tpu.vector_store %arg4[%c0_98, %c0_99], %227 {strides = array<i32>} : memref<2x32xf32, #tpu.memory_space<vmem>>, vector<2x32xf32>,
    %c0_100 = arith.constant 0 : index
    %c0_101 = arith.constant 0 : index
    %c0_102 = arith.constant 0 : index
    %229 = vector.load %arg1[%c0_100, %c0_101, %c0_102] : memref<2x4x256xf32, #tpu.memory_space<vmem>>, vector<1x4x256xf32>
    %230 = vector.shape_cast %229 : vector<1x4x256xf32> to vector<4x256xf32>
    %c17_i32_103 = arith.constant 17 : i32
    %231 = tpu.dynamic_rotate %230 by %c17_i32_103 dim 1 : vector<4x256xf32>, i32 -> vector<4x256xf32>
    %cst_104 = arith.constant 0.000000e+00 : f32
    %232 = vector.shape_cast %25 : vector<1x256xi1> to vector<1x256xi1>
    %233 = vector.broadcast %232 : vector<1x256xi1> to vector<4x256xi1>
    %234 = vector.broadcast %cst_104 : f32 to vector<4x256xf32>
    %235 = arith.select %233, %231, %234 : vector<4x256xi1>, vector<4x256xf32>
    %cst_105 = arith.constant dense<0.000000e+00> : vector<8x256xf32>
    %236 = tpu.matmul %0, %235, %cst_105 {dimension_numbers = #tpu.dot_dimension_numbers<[1], [0], [0], [1], [0, 0, 1, 1], [], []>} : vector<8x4xf32>, vector<4x256xf32>, vector<8x256xf32> -> vector<8x256xf32>
    %c16_i32_106 = arith.constant 16 : i32
    %237 = tpu.dynamic_rotate %230 by %c16_i32_106 dim 1 : vector<4x256xf32>, i32 -> vector<4x256xf32>
    %cst_107 = arith.constant 0.000000e+00 : f32
    %238 = vector.shape_cast %27 : vector<1x256xi1> to vector<1x256xi1>
    %239 = vector.broadcast %238 : vector<1x256xi1> to vector<4x256xi1>
    %240 = vector.broadcast %cst_107 : f32 to vector<4x256xf32>
    %241 = arith.select %239, %237, %240 : vector<4x256xi1>, vector<4x256xf32>
    %cst_108 = arith.constant dense<0.000000e+00> : vector<8x256xf32>
    %242 = tpu.matmul %1, %241, %cst_108 {dimension_numbers = #tpu.dot_dimension_numbers<[1], [0], [0], [1], [0, 0, 1, 1], [], []>} : vector<8x4xf32>, vector<4x256xf32>, vector<8x256xf32> -> vector<8x256xf32>
    %243 = arith.addf %236, %242 : vector<8x256xf32>
    %c15_i32_109 = arith.constant 15 : i32
    %244 = tpu.dynamic_rotate %230 by %c15_i32_109 dim 1 : vector<4x256xf32>, i32 -> vector<4x256xf32>
    %cst_110 = arith.constant 0.000000e+00 : f32
    %245 = vector.shape_cast %32 : vector<1x256xi1> to vector<1x256xi1>
    %246 = vector.broadcast %245 : vector<1x256xi1> to vector<4x256xi1>
    %247 = vector.broadcast %cst_110 : f32 to vector<4x256xf32>
    %248 = arith.select %246, %244, %247 : vector<4x256xi1>, vector<4x256xf32>
    %cst_111 = arith.constant dense<0.000000e+00> : vector<8x256xf32>
    %249 = tpu.matmul %2, %248, %cst_111 {dimension_numbers = #tpu.dot_dimension_numbers<[1], [0], [0], [1], [0, 0, 1, 1], [], []>} : vector<8x4xf32>, vector<4x256xf32>, vector<8x256xf32> -> vector<8x256xf32>
    %250 = arith.addf %243, %249 : vector<8x256xf32>
    %c1_i32_112 = arith.constant 1 : i32
    %251 = tpu.dynamic_rotate %230 by %c1_i32_112 dim 1 : vector<4x256xf32>, i32 -> vector<4x256xf32>
    %cst_113 = arith.constant 0.000000e+00 : f32
    %252 = vector.shape_cast %34 : vector<1x256xi1> to vector<1x256xi1>
    %253 = vector.broadcast %252 : vector<1x256xi1> to vector<4x256xi1>
    %254 = vector.broadcast %cst_113 : f32 to vector<4x256xf32>
    %255 = arith.select %253, %251, %254 : vector<4x256xi1>, vector<4x256xf32>
    %cst_114 = arith.constant dense<0.000000e+00> : vector<8x256xf32>
    %256 = tpu.matmul %3, %255, %cst_114 {dimension_numbers = #tpu.dot_dimension_numbers<[1], [0], [0], [1], [0, 0, 1, 1], [], []>} : vector<8x4xf32>, vector<4x256xf32>, vector<8x256xf32> -> vector<8x256xf32>
    %257 = arith.addf %250, %256 : vector<8x256xf32>
    %cst_115 = arith.constant dense<0.000000e+00> : vector<8x256xf32>
    %258 = tpu.matmul %4, %230, %cst_115 {dimension_numbers = #tpu.dot_dimension_numbers<[1], [0], [0], [1], [0, 0, 1, 1], [], []>} : vector<8x4xf32>, vector<4x256xf32>, vector<8x256xf32> -> vector<8x256xf32>
    %259 = arith.addf %257, %258 : vector<8x256xf32>
    %c255_i32_116 = arith.constant 255 : i32
    %260 = tpu.dynamic_rotate %230 by %c255_i32_116 dim 1 : vector<4x256xf32>, i32 -> vector<4x256xf32>
    %cst_117 = arith.constant 0.000000e+00 : f32
    %261 = vector.shape_cast %36 : vector<1x256xi1> to vector<1x256xi1>
    %262 = vector.broadcast %261 : vector<1x256xi1> to vector<4x256xi1>
    %263 = vector.broadcast %cst_117 : f32 to vector<4x256xf32>
    %264 = arith.select %262, %260, %263 : vector<4x256xi1>, vector<4x256xf32>
    %cst_118 = arith.constant dense<0.000000e+00> : vector<8x256xf32>
    %265 = tpu.matmul %5, %264, %cst_118 {dimension_numbers = #tpu.dot_dimension_numbers<[1], [0], [0], [1], [0, 0, 1, 1], [], []>} : vector<8x4xf32>, vector<4x256xf32>, vector<8x256xf32> -> vector<8x256xf32>
    %266 = arith.addf %259, %265 : vector<8x256xf32>
    %c241_i32_119 = arith.constant 241 : i32
    %267 = tpu.dynamic_rotate %230 by %c241_i32_119 dim 1 : vector<4x256xf32>, i32 -> vector<4x256xf32>
    %cst_120 = arith.constant 0.000000e+00 : f32
    %268 = vector.shape_cast %41 : vector<1x256xi1> to vector<1x256xi1>
    %269 = vector.broadcast %268 : vector<1x256xi1> to vector<4x256xi1>
    %270 = vector.broadcast %cst_120 : f32 to vector<4x256xf32>
    %271 = arith.select %269, %267, %270 : vector<4x256xi1>, vector<4x256xf32>
    %cst_121 = arith.constant dense<0.000000e+00> : vector<8x256xf32>
    %272 = tpu.matmul %6, %271, %cst_121 {dimension_numbers = #tpu.dot_dimension_numbers<[1], [0], [0], [1], [0, 0, 1, 1], [], []>} : vector<8x4xf32>, vector<4x256xf32>, vector<8x256xf32> -> vector<8x256xf32>
    %273 = arith.addf %266, %272 : vector<8x256xf32>
    %c240_i32_122 = arith.constant 240 : i32
    %274 = tpu.dynamic_rotate %230 by %c240_i32_122 dim 1 : vector<4x256xf32>, i32 -> vector<4x256xf32>
    %cst_123 = arith.constant 0.000000e+00 : f32
    %275 = vector.shape_cast %43 : vector<1x256xi1> to vector<1x256xi1>
    %276 = vector.broadcast %275 : vector<1x256xi1> to vector<4x256xi1>
    %277 = vector.broadcast %cst_123 : f32 to vector<4x256xf32>
    %278 = arith.select %276, %274, %277 : vector<4x256xi1>, vector<4x256xf32>
    %cst_124 = arith.constant dense<0.000000e+00> : vector<8x256xf32>
    %279 = tpu.matmul %7, %278, %cst_124 {dimension_numbers = #tpu.dot_dimension_numbers<[1], [0], [0], [1], [0, 0, 1, 1], [], []>} : vector<8x4xf32>, vector<4x256xf32>, vector<8x256xf32> -> vector<8x256xf32>
    %280 = arith.addf %273, %279 : vector<8x256xf32>
    %c239_i32_125 = arith.constant 239 : i32
    %281 = tpu.dynamic_rotate %230 by %c239_i32_125 dim 1 : vector<4x256xf32>, i32 -> vector<4x256xf32>
    %cst_126 = arith.constant 0.000000e+00 : f32
    %282 = vector.shape_cast %48 : vector<1x256xi1> to vector<1x256xi1>
    %283 = vector.broadcast %282 : vector<1x256xi1> to vector<4x256xi1>
    %284 = vector.broadcast %cst_126 : f32 to vector<4x256xf32>
    %285 = arith.select %283, %281, %284 : vector<4x256xi1>, vector<4x256xf32>
    %cst_127 = arith.constant dense<0.000000e+00> : vector<8x256xf32>
    %286 = tpu.matmul %8, %285, %cst_127 {dimension_numbers = #tpu.dot_dimension_numbers<[1], [0], [0], [1], [0, 0, 1, 1], [], []>} : vector<8x4xf32>, vector<4x256xf32>, vector<8x256xf32> -> vector<8x256xf32>
    %287 = arith.addf %280, %286 : vector<8x256xf32>
    %288 = vector.broadcast %9 : vector<8x1xf32> to vector<8x256xf32>
    %289 = arith.addf %287, %288 : vector<8x256xf32>
    %cst_128 = arith.constant 0.000000e+00 : f32
    %290 = vector.broadcast %cst_128 : f32 to vector<8x256xf32>
    %291 = arith.maximumf %289, %290 : vector<8x256xf32>
    %cst_129 = arith.constant dense<0.000000e+00> : vector<8xf32>
    %292 = vector.multi_reduction <add>, %291, %cst_129 [1] : vector<8x256xf32> to vector<8xf32>
    %293 = vector.shape_cast %292 : vector<8xf32> to vector<8x1xf32>
    %cst_130 = arith.constant 3.906250e-03 : f32
    %294 = vector.broadcast %cst_130 : f32 to vector<8x1xf32>
    %295 = arith.mulf %293, %294 : vector<8x1xf32>
    %296 = vector.broadcast %295 : vector<8x1xf32> to vector<8x32xf32>
    %297 = arith.mulf %296, %10 : vector<8x32xf32>
    %cst_131 = arith.constant dense<0.000000e+00> : vector<32xf32>
    %298 = vector.multi_reduction <add>, %297, %cst_131 [0] : vector<8x32xf32> to vector<32xf32>
    %299 = vector.shape_cast %298 : vector<32xf32> to vector<1x32xf32>
    %300 = arith.addf %299, %13 : vector<1x32xf32>
    %301 = arith.mulf %300, %300 : vector<1x32xf32>
    %cst_132 = arith.constant dense<0.000000e+00> : vector<1xf32>
    %302 = vector.multi_reduction <add>, %301, %cst_132 [1] : vector<1x32xf32> to vector<1xf32>
    %303 = vector.shape_cast %302 : vector<1xf32> to vector<1x1xf32>
    %cst_133 = arith.constant 1.000000e-24 : f32
    %304 = vector.broadcast %cst_133 : f32 to vector<1x1xf32>
    %305 = arith.maximumf %303, %304 : vector<1x1xf32>
    %306 = math.rsqrt %305 : vector<1x1xf32>
    %307 = vector.broadcast %306 : vector<1x1xf32> to vector<1x32xf32>
    %308 = arith.mulf %300, %307 : vector<1x32xf32>
    %c0_134 = arith.constant 0 : index
    %c0_135 = arith.constant 0 : index
    %309 = vector.load %arg5[%c0_134, %c0_135] : memref<2x32xf32, #tpu.memory_space<vmem>>, vector<1x32xf32>
    tpu.vector_store %arg5[%c0_134, %c0_135], %308 {strides = array<i32>} : memref<2x32xf32, #tpu.memory_space<vmem>>, vector<1x32xf32>,
    %c1_136 = arith.constant 1 : index
    %c0_137 = arith.constant 0 : index
    %c0_138 = arith.constant 0 : index
    %310 = vector.load %arg1[%c1_136, %c0_137, %c0_138] : memref<2x4x256xf32, #tpu.memory_space<vmem>>, vector<1x4x256xf32>
    %311 = vector.shape_cast %310 : vector<1x4x256xf32> to vector<4x256xf32>
    %c17_i32_139 = arith.constant 17 : i32
    %312 = tpu.dynamic_rotate %311 by %c17_i32_139 dim 1 : vector<4x256xf32>, i32 -> vector<4x256xf32>
    %cst_140 = arith.constant 0.000000e+00 : f32
    %313 = vector.shape_cast %25 : vector<1x256xi1> to vector<1x256xi1>
    %314 = vector.broadcast %313 : vector<1x256xi1> to vector<4x256xi1>
    %315 = vector.broadcast %cst_140 : f32 to vector<4x256xf32>
    %316 = arith.select %314, %312, %315 : vector<4x256xi1>, vector<4x256xf32>
    %cst_141 = arith.constant dense<0.000000e+00> : vector<8x256xf32>
    %317 = tpu.matmul %0, %316, %cst_141 {dimension_numbers = #tpu.dot_dimension_numbers<[1], [0], [0], [1], [0, 0, 1, 1], [], []>} : vector<8x4xf32>, vector<4x256xf32>, vector<8x256xf32> -> vector<8x256xf32>
    %c16_i32_142 = arith.constant 16 : i32
    %318 = tpu.dynamic_rotate %311 by %c16_i32_142 dim 1 : vector<4x256xf32>, i32 -> vector<4x256xf32>
    %cst_143 = arith.constant 0.000000e+00 : f32
    %319 = vector.shape_cast %27 : vector<1x256xi1> to vector<1x256xi1>
    %320 = vector.broadcast %319 : vector<1x256xi1> to vector<4x256xi1>
    %321 = vector.broadcast %cst_143 : f32 to vector<4x256xf32>
    %322 = arith.select %320, %318, %321 : vector<4x256xi1>, vector<4x256xf32>
    %cst_144 = arith.constant dense<0.000000e+00> : vector<8x256xf32>
    %323 = tpu.matmul %1, %322, %cst_144 {dimension_numbers = #tpu.dot_dimension_numbers<[1], [0], [0], [1], [0, 0, 1, 1], [], []>} : vector<8x4xf32>, vector<4x256xf32>, vector<8x256xf32> -> vector<8x256xf32>
    %324 = arith.addf %317, %323 : vector<8x256xf32>
    %c15_i32_145 = arith.constant 15 : i32
    %325 = tpu.dynamic_rotate %311 by %c15_i32_145 dim 1 : vector<4x256xf32>, i32 -> vector<4x256xf32>
    %cst_146 = arith.constant 0.000000e+00 : f32
    %326 = vector.shape_cast %32 : vector<1x256xi1> to vector<1x256xi1>
    %327 = vector.broadcast %326 : vector<1x256xi1> to vector<4x256xi1>
    %328 = vector.broadcast %cst_146 : f32 to vector<4x256xf32>
    %329 = arith.select %327, %325, %328 : vector<4x256xi1>, vector<4x256xf32>
    %cst_147 = arith.constant dense<0.000000e+00> : vector<8x256xf32>
    %330 = tpu.matmul %2, %329, %cst_147 {dimension_numbers = #tpu.dot_dimension_numbers<[1], [0], [0], [1], [0, 0, 1, 1], [], []>} : vector<8x4xf32>, vector<4x256xf32>, vector<8x256xf32> -> vector<8x256xf32>
    %331 = arith.addf %324, %330 : vector<8x256xf32>
    %c1_i32_148 = arith.constant 1 : i32
    %332 = tpu.dynamic_rotate %311 by %c1_i32_148 dim 1 : vector<4x256xf32>, i32 -> vector<4x256xf32>
    %cst_149 = arith.constant 0.000000e+00 : f32
    %333 = vector.shape_cast %34 : vector<1x256xi1> to vector<1x256xi1>
    %334 = vector.broadcast %333 : vector<1x256xi1> to vector<4x256xi1>
    %335 = vector.broadcast %cst_149 : f32 to vector<4x256xf32>
    %336 = arith.select %334, %332, %335 : vector<4x256xi1>, vector<4x256xf32>
    %cst_150 = arith.constant dense<0.000000e+00> : vector<8x256xf32>
    %337 = tpu.matmul %3, %336, %cst_150 {dimension_numbers = #tpu.dot_dimension_numbers<[1], [0], [0], [1], [0, 0, 1, 1], [], []>} : vector<8x4xf32>, vector<4x256xf32>, vector<8x256xf32> -> vector<8x256xf32>
    %338 = arith.addf %331, %337 : vector<8x256xf32>
    %cst_151 = arith.constant dense<0.000000e+00> : vector<8x256xf32>
    %339 = tpu.matmul %4, %311, %cst_151 {dimension_numbers = #tpu.dot_dimension_numbers<[1], [0], [0], [1], [0, 0, 1, 1], [], []>} : vector<8x4xf32>, vector<4x256xf32>, vector<8x256xf32> -> vector<8x256xf32>
    %340 = arith.addf %338, %339 : vector<8x256xf32>
    %c255_i32_152 = arith.constant 255 : i32
    %341 = tpu.dynamic_rotate %311 by %c255_i32_152 dim 1 : vector<4x256xf32>, i32 -> vector<4x256xf32>
    %cst_153 = arith.constant 0.000000e+00 : f32
    %342 = vector.shape_cast %36 : vector<1x256xi1> to vector<1x256xi1>
    %343 = vector.broadcast %342 : vector<1x256xi1> to vector<4x256xi1>
    %344 = vector.broadcast %cst_153 : f32 to vector<4x256xf32>
    %345 = arith.select %343, %341, %344 : vector<4x256xi1>, vector<4x256xf32>
    %cst_154 = arith.constant dense<0.000000e+00> : vector<8x256xf32>
    %346 = tpu.matmul %5, %345, %cst_154 {dimension_numbers = #tpu.dot_dimension_numbers<[1], [0], [0], [1], [0, 0, 1, 1], [], []>} : vector<8x4xf32>, vector<4x256xf32>, vector<8x256xf32> -> vector<8x256xf32>
    %347 = arith.addf %340, %346 : vector<8x256xf32>
    %c241_i32_155 = arith.constant 241 : i32
    %348 = tpu.dynamic_rotate %311 by %c241_i32_155 dim 1 : vector<4x256xf32>, i32 -> vector<4x256xf32>
    %cst_156 = arith.constant 0.000000e+00 : f32
    %349 = vector.shape_cast %41 : vector<1x256xi1> to vector<1x256xi1>
    %350 = vector.broadcast %349 : vector<1x256xi1> to vector<4x256xi1>
    %351 = vector.broadcast %cst_156 : f32 to vector<4x256xf32>
    %352 = arith.select %350, %348, %351 : vector<4x256xi1>, vector<4x256xf32>
    %cst_157 = arith.constant dense<0.000000e+00> : vector<8x256xf32>
    %353 = tpu.matmul %6, %352, %cst_157 {dimension_numbers = #tpu.dot_dimension_numbers<[1], [0], [0], [1], [0, 0, 1, 1], [], []>} : vector<8x4xf32>, vector<4x256xf32>, vector<8x256xf32> -> vector<8x256xf32>
    %354 = arith.addf %347, %353 : vector<8x256xf32>
    %c240_i32_158 = arith.constant 240 : i32
    %355 = tpu.dynamic_rotate %311 by %c240_i32_158 dim 1 : vector<4x256xf32>, i32 -> vector<4x256xf32>
    %cst_159 = arith.constant 0.000000e+00 : f32
    %356 = vector.shape_cast %43 : vector<1x256xi1> to vector<1x256xi1>
    %357 = vector.broadcast %356 : vector<1x256xi1> to vector<4x256xi1>
    %358 = vector.broadcast %cst_159 : f32 to vector<4x256xf32>
    %359 = arith.select %357, %355, %358 : vector<4x256xi1>, vector<4x256xf32>
    %cst_160 = arith.constant dense<0.000000e+00> : vector<8x256xf32>
    %360 = tpu.matmul %7, %359, %cst_160 {dimension_numbers = #tpu.dot_dimension_numbers<[1], [0], [0], [1], [0, 0, 1, 1], [], []>} : vector<8x4xf32>, vector<4x256xf32>, vector<8x256xf32> -> vector<8x256xf32>
    %361 = arith.addf %354, %360 : vector<8x256xf32>
    %c239_i32_161 = arith.constant 239 : i32
    %362 = tpu.dynamic_rotate %311 by %c239_i32_161 dim 1 : vector<4x256xf32>, i32 -> vector<4x256xf32>
    %cst_162 = arith.constant 0.000000e+00 : f32
    %363 = vector.shape_cast %48 : vector<1x256xi1> to vector<1x256xi1>
    %364 = vector.broadcast %363 : vector<1x256xi1> to vector<4x256xi1>
    %365 = vector.broadcast %cst_162 : f32 to vector<4x256xf32>
    %366 = arith.select %364, %362, %365 : vector<4x256xi1>, vector<4x256xf32>
    %cst_163 = arith.constant dense<0.000000e+00> : vector<8x256xf32>
    %367 = tpu.matmul %8, %366, %cst_163 {dimension_numbers = #tpu.dot_dimension_numbers<[1], [0], [0], [1], [0, 0, 1, 1], [], []>} : vector<8x4xf32>, vector<4x256xf32>, vector<8x256xf32> -> vector<8x256xf32>
    %368 = arith.addf %361, %367 : vector<8x256xf32>
    %369 = vector.broadcast %9 : vector<8x1xf32> to vector<8x256xf32>
    %370 = arith.addf %368, %369 : vector<8x256xf32>
    %cst_164 = arith.constant 0.000000e+00 : f32
    %371 = vector.broadcast %cst_164 : f32 to vector<8x256xf32>
    %372 = arith.maximumf %370, %371 : vector<8x256xf32>
    %cst_165 = arith.constant dense<0.000000e+00> : vector<8xf32>
    %373 = vector.multi_reduction <add>, %372, %cst_165 [1] : vector<8x256xf32> to vector<8xf32>
    %374 = vector.shape_cast %373 : vector<8xf32> to vector<8x1xf32>
    %cst_166 = arith.constant 3.906250e-03 : f32
    %375 = vector.broadcast %cst_166 : f32 to vector<8x1xf32>
    %376 = arith.mulf %374, %375 : vector<8x1xf32>
    %377 = vector.broadcast %376 : vector<8x1xf32> to vector<8x32xf32>
    %378 = arith.mulf %377, %10 : vector<8x32xf32>
    %cst_167 = arith.constant dense<0.000000e+00> : vector<32xf32>
    %379 = vector.multi_reduction <add>, %378, %cst_167 [0] : vector<8x32xf32> to vector<32xf32>
    %380 = vector.shape_cast %379 : vector<32xf32> to vector<1x32xf32>
    %381 = arith.addf %380, %13 : vector<1x32xf32>
    %382 = arith.mulf %381, %381 : vector<1x32xf32>
    %cst_168 = arith.constant dense<0.000000e+00> : vector<1xf32>
    %383 = vector.multi_reduction <add>, %382, %cst_168 [1] : vector<1x32xf32> to vector<1xf32>
    %384 = vector.shape_cast %383 : vector<1xf32> to vector<1x1xf32>
    %cst_169 = arith.constant 1.000000e-24 : f32
    %385 = vector.broadcast %cst_169 : f32 to vector<1x1xf32>
    %386 = arith.maximumf %384, %385 : vector<1x1xf32>
    %387 = math.rsqrt %386 : vector<1x1xf32>
    %388 = vector.broadcast %387 : vector<1x1xf32> to vector<1x32xf32>
    %389 = arith.mulf %381, %388 : vector<1x32xf32>
    %c1_170 = arith.constant 1 : index
    %c0_171 = arith.constant 0 : index
    %390 = vector.load %arg5[%c1_170, %c0_171] : memref<2x32xf32, #tpu.memory_space<vmem>>, vector<1x32xf32>
    tpu.vector_store %arg5[%c1_170, %c0_171], %389 {strides = array<i32>} : memref<2x32xf32, #tpu.memory_space<vmem>>, vector<1x32xf32>,
    %c0_172 = arith.constant 0 : index
    %c0_173 = arith.constant 0 : index
    %391 = vector.load %arg5[%c0_172, %c0_173] : memref<2x32xf32, #tpu.memory_space<vmem>>, vector<2x32xf32>
    %cst_174 = arith.constant dense<0.000000e+00> : vector<2x32xf32>
    %392 = tpu.matmul %391, %11, %cst_174 {dimension_numbers = #tpu.dot_dimension_numbers<[1], [0], [0], [1], [0, 0, 1, 1], [], []>} : vector<2x32xf32>, vector<32x32xf32>, vector<2x32xf32> -> vector<2x32xf32>
    %393 = vector.broadcast %14 : vector<1x32xf32> to vector<2x32xf32>
    %394 = arith.addf %392, %393 : vector<2x32xf32>
    %cst_175 = arith.constant 0.000000e+00 : f32
    %395 = vector.broadcast %cst_175 : f32 to vector<2x32xf32>
    %396 = arith.maximumf %394, %395 : vector<2x32xf32>
    %cst_176 = arith.constant dense<0.000000e+00> : vector<2x32xf32>
    %397 = tpu.matmul %396, %12, %cst_176 {dimension_numbers = #tpu.dot_dimension_numbers<[1], [0], [0], [1], [0, 0, 1, 1], [], []>} : vector<2x32xf32>, vector<32x32xf32>, vector<2x32xf32> -> vector<2x32xf32>
    %398 = vector.broadcast %15 : vector<1x32xf32> to vector<2x32xf32>
    %399 = arith.addf %397, %398 : vector<2x32xf32>
    %400 = arith.mulf %399, %399 : vector<2x32xf32>
    %cst_177 = arith.constant dense<0.000000e+00> : vector<2xf32>
    %401 = vector.multi_reduction <add>, %400, %cst_177 [1] : vector<2x32xf32> to vector<2xf32>
    %402 = vector.shape_cast %401 : vector<2xf32> to vector<2x1xf32>
    %cst_178 = arith.constant 1.000000e-24 : f32
    %403 = vector.broadcast %cst_178 : f32 to vector<2x1xf32>
    %404 = arith.maximumf %402, %403 : vector<2x1xf32>
    %405 = math.rsqrt %404 : vector<2x1xf32>
    %406 = vector.broadcast %405 : vector<2x1xf32> to vector<2x32xf32>
    %407 = arith.mulf %399, %406 : vector<2x32xf32>
    %c0_179 = arith.constant 0 : index
    %c0_180 = arith.constant 0 : index
    %408 = vector.load %arg6[%c0_179, %c0_180] : memref<2x32xf32, #tpu.memory_space<vmem>>, vector<2x32xf32>
    tpu.vector_store %arg6[%c0_179, %c0_180], %407 {strides = array<i32>} : memref<2x32xf32, #tpu.memory_space<vmem>>, vector<2x32xf32>,
    return
  }
}

</mosaic_0001>

<bundles_post_ra>
// kernel: _forward_pair.1
= control target key start
LH: loop header
LB: loop body
LE: loop exit
PB: predicated region body
PF: predicated region fallthrough
CT: control target
= control target key end

     0   :  { %12 = vsyncpa [#allocation3], 0  ;;  %s5149_s0 = inlined_call_operand.vmem [shape: f32[2,4,256], index: 0, kind: input, shape index: {}]   ;;  %s5150_s1 = inlined_call_operand.vmem [shape: f32[2,4,256], index: 1, kind: input, shape index: {}]   ;;  %s5151_s2 = inlined_call_operand.vmem [shape: f32[176,32], index: 2, kind: input, shape index: {}]   ;;  %s5152_s3 = inlined_call_operand.hbm [shape: f32[2,32], index: 3, kind: output, shape index: {0}]   ;;  %s5153_s4 = inlined_call_operand.hbm [shape: f32[2,32], index: 4, kind: output, shape index: {1}]   ;;  %s5154_s5 = inlined_call_operand.hbm [shape: f32[2,32], index: 5, kind: output, shape index: {2}]   ;;  %s5155_s6 = inlined_call_operand.hbm [shape: f32[2,32], index: 6, kind: output, shape index: {3}]  }
   0x1   :  { %13 = vsyncpa [#allocation5], 0  ;;  %v4161_v0 = vld [vmem:[%s5149_s0 + $0x8] sm:$0xff]  ;;  %v4166_v1 = vld [vmem:[%s5149_s0] sm:$0xff]  ;;  %s4107_s25 = smov 16  }
   0x2   :  { %953 = vrot.lane.b32.xlu1 %v4161_v0, %s4107_s25  ;;  %83 = vrot.lane.b32.xlu0 %v4166_v1, %s4107_s25  ;;  %v4174_v2 = vcombine.high %v4161_v0, %v4161_v0  ;;  %v4178_v3 = vcombine.high %v4166_v1, %v4166_v1 }
   0x3   :  { %14 = vsyncpa [#allocation8], 0  ;;  %v4108_v4 = vmov 0.0   ;;  %s4109_s0 = smov 17   ;;  %s4110_s26 = smov 15   ;;  %v4116_v5 = vmov 0   ;;  %v43_v7 = vlaneseq }
   0x4   :  { %171 = vmatprep.mubr.f32.mxu0 %v4108_v4  ;;  %1031 = vmatprep.mubr.f32.mxu1 %v4108_v4  ;;  %s4111_s27 = smov 1   ;;  %s4112_s28 = smov 127   ;;  %v30_v6 = vld [vmem:[%s5151_s2 + $0x48] sm:$0xff]  ;;  %v5182_v16 = vmov 0  ;;  %v5186_v18 = vmov 0  ;;  %vm5176_vm4 = vcmask 1043456  }
   0x5   :  { %s4113_s29 = smov 113   ;;  %s4114_s30 = smov 112   ;;  %3996 = vset.pattern.permute.xlu0 %v4116_v5  ;;  %v4245_v8 = vand.u32 127, %v43_v7  ;;  %v5188_v21 = vmov 0  ;;  %vm5161_vm7 = vcmask 31744   ;;  %v4303_v31 = vld [vmem:[%s5151_s2 + $0x8] sm:$0xff] }
   0x6   :  { %955 = vrot.lane.b32.xlu1 %v4174_v2, %s4107_s25  ;;  %85 = vrot.lane.b32.xlu0 %v4178_v3, %s4107_s25  ;;  %s4115_s7 = smov 111   ;;  %v4361_v48 = vld [vmem:[%s5151_s2] sm:$0xff]  ;;  %v4401_v62 = vld [vmem:[%s5151_s2 + $0x10] sm:$0xff]  ;;  %s4120_s14 = smov [#allocation2]  }
   0x7   :  { %v4248_v9 = vadd.s32 128, %v4245_v8  ;;  %v46_v11 = vshra.s32 %v4245_v8, 4  ;;  %v48_v12 = vand.u32 15, %v4245_v8  ;;  %vm5160_vm0 = vcmp.lt.s32.totalorder %v4245_v8, 16  ;;  %s3663_s15 = sshll.u32 %s4120_s14, 4  ;;  %s3664_s15 = int_to_ptr.vmem [resolvable:$true] %s3663_s15 }
   0x8   :  { %vm5158_vm6 = vcmp.lt.s32.totalorder %v4245_v8, 17  ;;  %vm5156_vm13 = vcmp.lt.s32.totalorder %v4245_v8, 15  ;;  %vm5157_vm15 = vcmp.lt.s32.totalorder %v4245_v8, 1 }
   0x9   :  { %v47_v10 = vshra.s32 %v4248_v9, 4  ;;  %v49_v15 = vand.u32 15, %v4248_v9  ;;  %vm4263_vm2 = vcmp.ge.s32.totalorder %v46_v11, 1  ;;  %vm4267_vm3 = vcmp.ge.s32.totalorder %v48_v12, 1  ;;  %v4471_v9 = vld [vmem:[%s5151_s2 + $0x20] sm:$0xff] }
   0xa   :  { %72 = vrot.lane.b32.xlu1 %v4178_v3, %s4109_s0  ;;  %70 = vrot.lane.b32.xlu0 %v4166_v1, %s4109_s0  ;;  %v5187_v18 = vsel %vm4267_vm3, 4294967295, %v5186_v18  ;;  %vm4292_vm8 = vmand %vm4263_vm2, %vm4267_vm3  ;;  %vm4332_vm10 = vcmp.lt.s32.totalorder %v48_v12, 15 }
   0xb   :  { %vm4257_vm1 = vcmp.ge.s32.totalorder %v47_v10, 1  ;;  %vm4271_vm5 = vcmp.ge.s32.totalorder %v49_v15, 1  ;;  %vm4337_vm11 = vcmp.lt.s32.totalorder %v49_v15, 15  ;;  %vm4353_vm12 = vmand %vm4263_vm2, %vm4332_vm10 }
   0xc   :  { %v5183_v16 = vsel %vm4257_vm1, 4294967295, %v5182_v16  ;;  %v5189_v21 = vsel %vm4271_vm5, 4294967295, %v5188_v21  ;;  %vm4311_vm9 = vmand %vm4257_vm1, %vm4271_vm5 }
   0xd   :  { %vm4368_vm14 = vmand %vm4257_vm1, %vm4337_vm11 }
   0xe   :  { %947 = vrot.lane.b32.xlu1 %v4174_v2, %s4109_s0  ;;  %945 = vrot.lane.b32.xlu0 %v4161_v0, %s4109_s0 }
  0x12   :  { %260 = vrot.lane.b32.xlu1 %v4178_v3, %s4110_s26  ;;  %258 = vrot.lane.b32.xlu0 %v4166_v1, %s4110_s26 }
  0x16   :  { %1117 = vrot.lane.b32.xlu1 %v4174_v2, %s4110_s26  ;;  %1115 = vrot.lane.b32.xlu0 %v4161_v0, %s4110_s26 }
  0x1a   :  { %355 = vrot.lane.b32.xlu1 %v4178_v3, %s4111_s27  ;;  %353 = vrot.lane.b32.xlu0 %v4166_v1, %s4111_s27 }
  0x1e   :  { %1204 = vrot.lane.b32.xlu1 %v4174_v2, %s4111_s27  ;;  %1202 = vrot.lane.b32.xlu0 %v4161_v0, %s4111_s27 }
  0x22   :  { %530 = vrot.lane.b32.xlu1 %v4178_v3, %s4112_s28  ;;  %528 = vrot.lane.b32.xlu0 %v4166_v1, %s4112_s28 }
  0x26   :  { %1368 = vrot.lane.b32.xlu1 %v4174_v2, %s4112_s28  ;;  %1366 = vrot.lane.b32.xlu0 %v4161_v0, %s4112_s28 }
  0x2a   :  { %625 = vrot.lane.b32.xlu1 %v4178_v3, %s4113_s29  ;;  %623 = vrot.lane.b32.xlu0 %v4166_v1, %s4113_s29 }
  0x2e   :  { %1455 = vrot.lane.b32.xlu1 %v4174_v2, %s4113_s29  ;;  %1453 = vrot.lane.b32.xlu0 %v4161_v0, %s4113_s29 }
  0x32   :  { %720 = vrot.lane.b32.xlu1 %v4178_v3, %s4114_s30  ;;  %718 = vrot.lane.b32.xlu0 %v4166_v1, %s4114_s30 }
  0x36   :  { %1542 = vrot.lane.b32.xlu1 %v4174_v2, %s4114_s30  ;;  %1540 = vrot.lane.b32.xlu0 %v4161_v0, %s4114_s30 }
  0x3a   :  { %815 = vrot.lane.b32.xlu1 %v4178_v3, %s4115_s7  ;;  %813 = vrot.lane.b32.xlu0 %v4166_v1, %s4115_s7 }
  0x3e   :  { %1629 = vrot.lane.b32.xlu1 %v4174_v2, %s4115_s7  ;;  %1627 = vrot.lane.b32.xlu0 %v4161_v0, %s4115_s7 }
  0x42   :  { %910 = vperm.xlu0 %3996, %v30_v6  }
  0x74   :  { %v954_v13 = vpop.permute.xlu1 %953  ;;  %v84_v14 = vpop.permute.xlu0 %83 }
  0x78   :  { %v956_v19 = vpop.permute.xlu1 %955  ;;  %v86_v20 = vpop.permute.xlu0 %85 }
  0x79   :  { %v958_v22 = vsel %vm5160_vm0, %v956_v19, %v954_v13  ;;  %v89_v23 = vsel %vm5160_vm0, %v86_v20, %v84_v14  ;;  %v88_v24 = vsel %vm5160_vm0, %v84_v14, %v86_v20  ;;  %v957_v25 = vsel %vm5160_vm0, %v954_v13, %v956_v19 }
  0x7a   :  { %v95_v26 = vsel %vm4257_vm1, %v88_v24, 0.0  ;;  %v960_v27 = vsel %vm4257_vm1, %v957_v25, 0.0  ;;  %v94_v29 = vsel %vm4263_vm2, %v89_v23, 0.0  ;;  %v959_v30 = vsel %vm4263_vm2, %v958_v22, 0.0  ;;  %v4434_v24 = vld [vmem:[%s5151_s2 + $0x18] sm:$0xff] }
  0x7b   :  { %3712 = vmatprep.subr.msk.mxu0 %vm5176_vm4, %v95_v26  ;;  %3740 = vmatprep.subr.msk.mxu1 %vm5176_vm4, %v960_v27  ;;  %vm4495_vm0 = vcmp.lt.s32.totalorder %v46_v11, 15  ;;  %v5208_v11 = vmov 0 }
  0x7c   :  { %v73_v33 = vpop.permute.xlu1 %72  ;;  %v71_v34 = vpop.permute.xlu0 %70  ;;  %3713 = vmatpush1.msk.msra.mxu0 %vm5176_vm4, %v94_v29  ;;  %3741 = vmatpush1.msk.msra.mxu1 %vm5176_vm4, %v959_v30  ;;  %v5202_v29 = vmov 0 }
  0x7d   :  { %v75_v35 = vsel %vm5158_vm6, %v71_v34, %v73_v33  ;;  %v76_v36 = vsel %vm5158_vm6, %v73_v33, %v71_v34  ;;  %3714 = vmatmul.mubr.msk.f32.vlgmr.msra.gmra.mrb[0].mxu0 %vm5161_vm7, %v4303_v31  ;;  %3742 = vmatmul.mubr.msk.f32.vlgmr.msra.gmra.mrb[0].mxu1 %vm5161_vm7, %v4303_v31 }
  0x7e   :  { %v81_v37 = vsel %vm4292_vm8, %v76_v36, 0.0  ;;  %v82_v38 = vsel %vm4311_vm9, %v75_v35, 0.0  ;;  %251 = vmatprep.mubr.f32.mxu0 %v4108_v4  ;;  %1108 = vmatprep.mubr.f32.mxu1 %v4108_v4  ;;  %v5204_v36 = vmov 0 }
  0x7f   :  { %3715 = vmatprep.subr.msk.mxu0 %vm5176_vm4, %v82_v38 }
  0x80   :  { %v948_v40 = vpop.permute.xlu1 %947  ;;  %v946_v41 = vpop.permute.xlu0 %945  ;;  %3716 = vmatpush1.msk.msra.mxu0 %vm5176_vm4, %v81_v37 }
  0x81   :  { %v949_v43 = vsel %vm5158_vm6, %v946_v41, %v948_v40  ;;  %v950_v44 = vsel %vm5158_vm6, %v948_v40, %v946_v41  ;;  %vm5164_vm6 = vcmp.lt.s32.totalorder %v4245_v8, 113  ;;  %v5206_v40 = vmov 0 }
  0x82   :  { %v951_v45 = vsel %vm4292_vm8, %v950_v44, 0.0  ;;  %v952_v46 = vsel %vm4311_vm9, %v949_v43, 0.0  ;;  %v5207_v40 = vsel %vm4495_vm0, 4294967295, %v5206_v40 }
  0x83   :  { %3743 = vmatprep.subr.msk.mxu1 %vm5176_vm4, %v952_v46 }
  0x84   :  { %v261_v50 = vpop.permute.xlu1 %260  ;;  %v259_v51 = vpop.permute.xlu0 %258  ;;  %3744 = vmatpush1.msk.msra.mxu1 %vm5176_vm4, %v951_v45 }
  0x85   :  { %v263_v52 = vsel %vm5156_vm13, %v259_v51, %v261_v50  ;;  %v264_v53 = vsel %vm5156_vm13, %v261_v50, %v259_v51  ;;  %3717 = vmatmul.mubr.msk.f32.vlgmr.msra.gmra.mrb[0].mxu0 %vm5161_vm7, %v4361_v48  ;;  %3745 = vmatmul.mubr.msk.f32.vlgmr.msra.gmra.mrb[0].mxu1 %vm5161_vm7, %v4361_v48 }
  0x86   :  { %v269_v54 = vsel %vm4353_vm12, %v264_v53, 0.0  ;;  %v270_v55 = vsel %vm4368_vm14, %v263_v52, 0.0  ;;  %344 = vmatprep.mubr.f32.mxu0 %v4108_v4  ;;  %1193 = vmatprep.mubr.f32.mxu1 %v4108_v4  ;;  %v4525_v52 = vld [vmem:[%s5151_s2 + $0x28] sm:$0xff] }
  0x87   :  { %3718 = vmatprep.subr.msk.mxu0 %vm5176_vm4, %v270_v55 }
  0x88   :  { %v1118_v56 = vpop.permute.xlu1 %1117  ;;  %v1116_v57 = vpop.permute.xlu0 %1115  ;;  %3719 = vmatpush1.msk.msra.mxu0 %vm5176_vm4, %v269_v54 }
  0x89   :  { %v1119_v58 = vsel %vm5156_vm13, %v1116_v57, %v1118_v56  ;;  %v1120_v59 = vsel %vm5156_vm13, %v1118_v56, %v1116_v57  ;;  %vm5159_vm13 = vcmp.lt.s32.totalorder %v4245_v8, 127 }
  0x8a   :  { %v1121_v60 = vsel %vm4353_vm12, %v1120_v59, 0.0  ;;  %v1122_v61 = vsel %vm4368_vm14, %v1119_v58, 0.0 }
  0x8b   :  { %3746 = vmatprep.subr.msk.mxu1 %vm5176_vm4, %v1122_v61 }
  0x8c   :  { %v356_v63 = vpop.permute.xlu1 %355  ;;  %v354_v5 = vpop.permute.xlu0 %353  ;;  %3747 = vmatpush1.msk.msra.mxu1 %vm5176_vm4, %v1121_v60 }
  0x8d   :  { %v358_v6 = vsel %vm5157_vm15, %v354_v5, %v356_v63  ;;  %v359_v7 = vsel %vm5157_vm15, %v356_v63, %v354_v5  ;;  %3720 = vmatmul.mubr.msk.f32.vlgmr.msra.gmra.mrb[0].mxu0 %vm5161_vm7, %v4401_v62  ;;  %3748 = vmatmul.mubr.msk.f32.vlgmr.msra.gmra.mrb[0].mxu1 %vm5161_vm7, %v4401_v62 }
  0x8e   :  { %v364_v12 = vsel %vm4267_vm3, %v359_v7, 0.0  ;;  %v365_v13 = vsel %vm4271_vm5, %v358_v6, 0.0  ;;  %439 = vmatprep.mubr.f32.mxu0 %v4108_v4  ;;  %1280 = vmatprep.mubr.f32.mxu1 %v4108_v4  ;;  %v4557_v7 = vld [vmem:[%s5151_s2 + $0x30] sm:$0xff] }
  0x8f   :  { %3721 = vmatprep.subr.msk.mxu0 %vm5176_vm4, %v365_v13 }
  0x90   :  { %v1205_v14 = vpop.permute.xlu1 %1204  ;;  %v1203_v15 = vpop.permute.xlu0 %1202  ;;  %3722 = vmatpush1.msk.msra.mxu0 %vm5176_vm4, %v364_v12 }
  0x91   :  { %v1206_v19 = vsel %vm5157_vm15, %v1203_v15, %v1205_v14  ;;  %v1207_v20 = vsel %vm5157_vm15, %v1205_v14, %v1203_v15  ;;  %3724 = vmatprep.subr.msk.mxu0 %vm5176_vm4, %v4178_v3  ;;  %vm4456_vm15 = vcmp.lt.s32.totalorder %v47_v10, 15 }
  0x92   :  { %v1208_v22 = vsel %vm4267_vm3, %v1207_v20, 0.0  ;;  %v1209_v23 = vsel %vm4271_vm5, %v1206_v19, 0.0  ;;  %v5203_v29 = vsel %vm4456_vm15, 4294967295, %v5202_v29 }
  0x93   :  { %3749 = vmatprep.subr.msk.mxu1 %vm5176_vm4, %v1209_v23 }
  0x94   :  { %3750 = vmatpush1.msk.msra.mxu1 %vm5176_vm4, %v1208_v22  ;;  %v531_v25 = vpop.permute.xlu1 %530  ;;  %v529_v26 = vpop.permute.xlu0 %528 }
  0x95   :  { %3723 = vmatmul.mubr.msk.f32.vlgmr.msra.gmra.mrb[0].mxu0 %vm5161_vm7, %v4434_v24  ;;  %3751 = vmatmul.mubr.msk.f32.vlgmr.msra.gmra.mrb[0].mxu1 %vm5161_vm7, %v4434_v24  ;;  %v534_v3 = vsel %vm5159_vm13, %v531_v25, %v529_v26  ;;  %v533_v30 = vsel %vm5159_vm13, %v529_v26, %v531_v25  ;;  %v5217_v25 = vmov 0 }
  0x96   :  { %v540_v27 = vsel %vm4337_vm11, %v534_v3, 0.0  ;;  %3752 = vmatprep.subr.msk.mxu1 %vm5176_vm4, %v4174_v2  ;;  %3725 = vmatpush1.msk.msra.mxu0 %vm5176_vm4, %v4166_v1  ;;  %v539_v34 = vsel %vm4332_vm10, %v533_v30, 0.0 }
  0x97   :  { %519 = vmatprep.mubr.f32.mxu0 %v4108_v4  ;;  %3753 = vmatpush1.msk.msra.mxu1 %vm5176_vm4, %v4161_v0 }
  0x98   :  { %1357 = vmatprep.mubr.f32.mxu1 %v4108_v4  ;;  %3727 = vmatprep.subr.msk.mxu0 %vm5176_vm4, %v540_v27  ;;  %v1369_v2 = vpop.permute.xlu1 %1368  ;;  %v1367_v1 = vpop.permute.xlu0 %1366 }
  0x99   :  { %v1370_v33 = vsel %vm5159_vm13, %v1367_v1, %v1369_v2  ;;  %v1371_v0 = vsel %vm5159_vm13, %v1369_v2, %v1367_v1  ;;  %vm4485_vm13 = vmand %vm4456_vm15, %vm4271_vm5  ;;  %v4605_v1 = vld [vmem:[%s5151_s2 + $0x38] sm:$0xff] }
  0x9a   :  { %v1373_v10 = vsel %vm4337_vm11, %v1371_v0, 0.0  ;;  %v1372_v35 = vsel %vm4332_vm10, %v1370_v33, 0.0  ;;  %v5205_v36 = vsel %vm4485_vm13, 4294967295, %v5204_v36 }
  0x9b   :  { %3755 = vmatprep.subr.msk.mxu1 %vm5176_vm4, %v1373_v10 }
  0x9c   :  { %v626_v37 = vpop.permute.xlu1 %625  ;;  %v624_v38 = vpop.permute.xlu0 %623 }
  0x9d   :  { %3726 = vmatmul.mubr.msk.f32.vlgmr.msra.gmra.mrb[0].mxu0 %vm5161_vm7, %v4471_v9  ;;  %3754 = vmatmul.mubr.msk.f32.vlgmr.msra.gmra.mrb[0].mxu1 %vm5161_vm7, %v4471_v9  ;;  %v629_v41 = vsel %vm5164_vm6, %v626_v37, %v624_v38  ;;  %vm4511_vm7 = vmand %vm4495_vm0, %vm4267_vm3  ;;  %v628_v44 = vsel %vm5164_vm6, %v624_v38, %v626_v37  ;;  %vm5167_vm3 = vcmp.lt.s32.totalorder %v4245_v8, 112 }
  0x9e   :  { %3728 = vmatpush1.msk.msra.mxu0 %vm5176_vm4, %v539_v34  ;;  %v635_v43 = vsel %vm4485_vm13, %v629_v41, 0.0  ;;  %3756 = vmatpush1.msk.msra.mxu1 %vm5176_vm4, %v1372_v35  ;;  %v5209_v11 = vsel %vm4511_vm7, 4294967295, %v5208_v11  ;;  %v634_v54 = vsel %vm4511_vm7, %v628_v44, 0.0  ;;  %v4625_v34 = vld [vmem:[%s5151_s2 + $0x40] sm:$0xff] }
  0x9f   :  { %614 = vmatprep.mubr.f32.mxu0 %v4108_v4  ;;  %1444 = vmatprep.mubr.f32.mxu1 %v4108_v4 }
  0xa0   :  { %3730 = vmatprep.subr.msk.mxu0 %vm5176_vm4, %v635_v43  ;;  %v1456_v45 = vpop.permute.xlu1 %1455  ;;  %v1454_v46 = vpop.permute.xlu0 %1453 }
  0xa1   :  { %v1457_v50 = vsel %vm5164_vm6, %v1454_v46, %v1456_v45  ;;  %v1458_v51 = vsel %vm5164_vm6, %v1456_v45, %v1454_v46  ;;  %vm5210_vm6 = vcmask 31744  }
  0xa2   :  { %v1460_v53 = vsel %vm4485_vm13, %v1458_v51, 0.0  ;;  %v1459_v55 = vsel %vm4511_vm7, %v1457_v50, 0.0  ;;  %vm5211_vm5 = vmmov %vm5210_vm6  ;;  %vm5216_vm7 = vcmp.lt.s32.totalorder %v4245_v8, 111 }
  0xa3   :  { %3758 = vmatprep.subr.msk.mxu1 %vm5176_vm4, %v1460_v53 }
  0xa4   :  { %v721_v56 = vpop.permute.xlu1 %720  ;;  %v719_v57 = vpop.permute.xlu0 %718 }
  0xa5   :  { %3729 = vmatmul.mubr.msk.f32.vlgmr.msra.gmra.mrb[0].mxu0 %vm5210_vm6, %v4525_v52  ;;  %3757 = vmatmul.mubr.msk.f32.vlgmr.msra.gmra.mrb[0].mxu1 %vm5211_vm5, %v4525_v52  ;;  %v724_v58 = vsel %vm5167_vm3, %v721_v56, %v719_v57  ;;  %v723_v60 = vsel %vm5167_vm3, %v719_v57, %v721_v56  ;;  %vm4571_vm6 = vmand %vm4456_vm15, %vm4337_vm11 }
  0xa6   :  { %3731 = vmatpush1.msk.msra.mxu0 %vm5176_vm4, %v634_v54  ;;  %v730_v59 = vsel %vm4456_vm15, %v724_v58, 0.0  ;;  %3759 = vmatpush1.msk.msra.mxu1 %vm5176_vm4, %v1459_v55  ;;  %v729_v13 = vsel %vm4495_vm0, %v723_v60, 0.0  ;;  %v4640_v58 = vld [vmem:[%s5151_s2 + $0x50] sm:$0xff] }
  0xa7   :  { %709 = vmatprep.mubr.f32.mxu0 %v4108_v4  ;;  %1531 = vmatprep.mubr.f32.mxu1 %v4108_v4 }
  0xa8   :  { %3733 = vmatprep.subr.msk.mxu0 %vm5176_vm4, %v730_v59  ;;  %v1543_v61 = vpop.permute.xlu1 %1542  ;;  %v1541_v63 = vpop.permute.xlu0 %1540 }
  0xa9   :  { %v1544_v5 = vsel %vm5167_vm3, %v1541_v63, %v1543_v61  ;;  %v1545_v6 = vsel %vm5167_vm3, %v1543_v61, %v1541_v63  ;;  %vm5214_vm3 = vmmov %vm5211_vm5 }
  0xaa   :  { %v1547_v12 = vsel %vm4456_vm15, %v1545_v6, 0.0  ;;  %v1546_v14 = vsel %vm4495_vm0, %v1544_v5, 0.0  ;;  %vm5215_vm5 = vmmov %vm5214_vm3 }
  0xab   :  { %3761 = vmatprep.subr.msk.mxu1 %vm5176_vm4, %v1547_v12 }
  0xac   :  { %v816_v19 = vpop.permute.xlu1 %815  ;;  %v814_v20 = vpop.permute.xlu0 %813 }
  0xad   :  { %3732 = vmatmul.mubr.msk.f32.vlgmr.msra.gmra.mrb[0].mxu0 %vm5214_vm3, %v4557_v7  ;;  %3760 = vmatmul.mubr.msk.f32.vlgmr.msra.gmra.mrb[0].mxu1 %vm5215_vm5, %v4557_v7  ;;  %v819_v22 = vsel %vm5216_vm7, %v816_v19, %v814_v20  ;;  %vm4591_vm3 = vmand %vm4495_vm0, %vm4332_vm10  ;;  %v818_v26 = vsel %vm5216_vm7, %v814_v20, %v816_v19 }
  0xae   :  { %3734 = vmatpush1.msk.msra.mxu0 %vm5176_vm4, %v729_v13  ;;  %v825_v23 = vsel %vm4571_vm6, %v819_v22, 0.0  ;;  %3762 = vmatpush1.msk.msra.mxu1 %vm5176_vm4, %v1546_v14  ;;  %v5218_v25 = vsel %vm4591_vm3, 4294967295, %v5217_v25  ;;  %vm5219_vm5 = vmmov %vm5216_vm7  ;;  %v824_v0 = vsel %vm4591_vm3, %v818_v26, 0.0  ;;  %vm5221_vm7 = vcmask 31744  }
  0xaf   :  { %804 = vmatprep.mubr.f32.mxu0 %v4108_v4  ;;  %1618 = vmatprep.mubr.f32.mxu1 %v4108_v4  ;;  %vm5220_vm15 = vmmov %vm5219_vm5 }
  0xb0   :  { %3736 = vmatprep.subr.msk.mxu0 %vm5176_vm4, %v825_v23  ;;  %v1630_v3 = vpop.permute.xlu1 %1629  ;;  %v1628_v27 = vpop.permute.xlu0 %1627 }
  0xb1   :  { %v1631_v30 = vsel %vm5219_vm5, %v1628_v27, %v1630_v3  ;;  %v1632_v2 = vsel %vm5220_vm15, %v1630_v3, %v1628_v27  ;;  %vm5222_vm15 = vmmov %vm5221_vm7 }
  0xb2   :  { %v1634_v33 = vsel %vm4571_vm6, %v1632_v2, 0.0  ;;  %v1633_v10 = vsel %vm4591_vm3, %v1631_v30, 0.0  ;;  %vm5223_vm5 = vmmov %vm5221_vm7 }
  0xb3   :  { %3764 = vmatprep.subr.msk.mxu1 %vm5176_vm4, %v1634_v33  ;;  %v4649_v33 = vld [vmem:[%s5151_s2 + $0x98] sm:$0x1] }
  0xb5   :  { %3735 = vmatmul.mubr.msk.f32.vlgmr.msra.gmra.mrb[0].mxu0 %vm5221_vm7, %v4605_v1  ;;  %3763 = vmatmul.mubr.msk.f32.vlgmr.msra.gmra.mrb[0].mxu1 %vm5222_vm15, %v4605_v1  ;;  %vm5224_vm7 = vmmov %vm5223_vm5  ;;  %vm5174_vm15 = vcmask 261120  }
  0xb6   :  { %3737 = vmatpush1.msk.msra.mxu0 %vm5176_vm4, %v824_v0  ;;  %3765 = vmatpush1.msk.msra.mxu1 %vm5176_vm4, %v1633_v10 }
  0xb7   :  { %899 = vmatprep.mubr.f32.mxu0 %v4108_v4  ;;  %1705 = vmatprep.mubr.f32.mxu1 %v4108_v4 }
  0xbd   :  { %3738 = vmatmul.mubr.msk.f32.vlgmr.msra.gmra.mrb[0].mxu0 %vm5223_vm5, %v4625_v34  ;;  %3766 = vmatmul.mubr.msk.f32.vlgmr.msra.gmra.mrb[0].mxu1 %vm5224_vm7, %v4625_v34  ;;  %vm5175_vm5 = vcmask 253952   ;;  %vm5172_vm7 = vmmov 0  }
  0xbe   :  { %3856 = vmatprep.mubr.msk.f32.mxu0 %vm5172_vm7, %v4108_v4  ;;  %3867 = vmatprep.mubr.msk.f32.mxu1 %vm5172_vm7, %v4108_v4  ;;  %vm5225_vm7 = vcmp.lt.s32.totalorder %v4245_v8, 16 }
  0xc1   :  { %v4631_v35 = vpop.permute.xlu0 %910 }
 0x190   :  { %v901_v37 = vpop.f32.mrb[0].mxu0  ;;  %v1707_v38 = vpop.f32.mrb[0].mxu1 }
 0x191   :  { %v913_v41 = vadd.f32 %v4631_v35, %v901_v37  ;;  %v1714_v43 = vadd.f32 %v1707_v38, %v4631_v35  ;;  %v903_v44 = vpop.f32.mrb[1].mxu0  ;;  %v1709_v45 = vpop.f32.mrb[1].mxu1 }
 0x192   :  { %v914_v46 = vadd.f32 %v4631_v35, %v903_v44  ;;  %v1715_v50 = vadd.f32 %v1709_v45, %v4631_v35 }
 0x193   :  { %v915_v51 = vmax.f32 %v913_v41, 0.0  ;;  %v1716_v53 = vmax.f32 %v1714_v43, 0.0 }
 0x194   :  { %v916_v54 = vmax.f32 %v914_v46, 0.0  ;;  %v1717_v55 = vmax.f32 %v1715_v50, 0.0  ;;  %v4666_v46 = vld [vmem:[%s5150_s1] sm:$0xff] }
 0x195   :  { %v4672_v50 = vcombine.high %v4666_v46, %v4666_v46 }
 0x196   :  { %v1718_v56 = vadd.f32 %v1717_v55, %v1716_v53  ;;  %v917_v57 = vadd.f32 %v916_v54, %v915_v51  ;;  %v4677_v51 = vld [vmem:[%s5150_s1 + $0x8] sm:$0xff]  ;;  %v32_v54 = vld [vmem:[%s5151_s2 + $0x58] sm:$0xff]  ;;  %v33_v55 = vld [vmem:[%s5151_s2 + $0x60] sm:$0xff] }
 0x197   :  { %v4683_v53 = vcombine.high %v4677_v51, %v4677_v51 }
 0x198   :  { %1719 = vadd.xlane.f32.xlu0 %v1718_v56  ;;  %918 = vadd.xlane.f32.xlu1 %v917_v57  ;;  %v4699_v56 = vpack.c.bf16 %v33_v55, %v32_v54  ;;  %v4117_v57 = vmov 0.0|0.0  }
 0x199   :  { %3892 = vmatprep.subr.bf16.mxu0 %v4117_v57  ;;  %3898 = vmatprep.subr.bf16.mxu1 %v4117_v57 }
 0x19a   :  { %3894 = vmatpush3.bf16.msra.mxu0 %v4699_v56 }
 0x19b   :  { %3895 = vmatprep.subr.bf16.mxu0 %v4117_v57 }
 0x225   :  { %v1720_v59 = vpop.xlane.xlu0 %1719  ;;  %v919_v60 = vpop.xlane.xlu1 %918 }
 0x226   :  { %v1721_v61 = vmul.f32 0.00390625, %v1720_v59  ;;  %v920_v63 = vmul.f32 0.00390625, %v919_v60  ;;  %v34_v59 = vld [vmem:[%s5151_s2 + $0x68] sm:$0xff]  ;;  %v35_v60 = vld [vmem:[%s5151_s2 + $0x70] sm:$0xff] }
 0x228   :  { %v1722_v5 = vmul.f32 %v1721_v61, %v4640_v58  ;;  %v921_v6 = vmul.f32 %v920_v63, %v4640_v58  ;;  %v4711_v61 = vpack.c.bf16 %v35_v60, %v34_v59  ;;  %v36_v63 = vld [vmem:[%s5151_s2 + $0x78] sm:$0xff] }
 0x22a   :  { %v1723_v12 = vsel %vm5174_vm15, %v1722_v5, 0.0  ;;  %v923_v13 = vsel %vm5174_vm15, %v921_v6, 0.0  ;;  %3897 = vmatpush3.bf16.msra.mxu0 %v4711_v61  ;;  %v37_v5 = vld [vmem:[%s5151_s2 + $0x80] sm:$0xff]  ;;  %vm5226_vm15 = vmmov %vm5225_vm7 }
 0x22b   :  { %v1724_v14 = vrot.slane %v1723_v12, 4  ;;  %v924_v19 = vrot.slane %v923_v13, 4  ;;  %v4776_v6 = vpack.c.bf16 %v37_v5, %v36_v63 }
 0x22d   :  { %v1725_v20 = vadd.f32 %v1724_v14, %v1723_v12  ;;  %v925_v22 = vadd.f32 %v924_v19, %v923_v13  ;;  %3900 = vmatpush3.bf16.msra.mxu1 %v4776_v6 }
 0x22e   :  { %3901 = vmatprep.subr.bf16.mxu1 %v4117_v57 }
 0x22f   :  { %v1726_v23 = vrot.slane %v1725_v20, 2  ;;  %v926_v26 = vrot.slane %v925_v22, 2 }
 0x231   :  { %v1727_v3 = vadd.f32 %v1726_v23, %v1725_v20  ;;  %v927_v27 = vadd.f32 %v926_v26, %v925_v22 }
 0x233   :  { %v1728_v30 = vrot.slane %v1727_v3, 1  ;;  %v928_v2 = vrot.slane %v927_v27, 1 }
 0x235   :  { %v1729_v0 = vadd.f32 %v1728_v30, %v1727_v3  ;;  %v929_v10 = vadd.f32 %v928_v2, %v927_v27 }
 0x237   :  { %v4652_v37 = vadd.f32 %v1729_v0, %v4649_v33  ;;  %v4655_v38 = vadd.f32 %v929_v10, %v4649_v33 }
 0x239   :  { %v1731_v41 = vmul.f32 %v4652_v37, %v4652_v37  ;;  %v931_v43 = vmul.f32 %v4655_v38, %v4655_v38 }
 0x23b   :  { %v1732_v44 = vsel %vm5175_vm5, %v1731_v41, 0.0  ;;  %v933_v45 = vsel %vm5175_vm5, %v931_v43, 0.0  ;;  %vm5227_vm5 = vmmov %vm5225_vm7 }
 0x23c   :  { %1733 = vadd.xlane.f32.xlu0 %v1732_v44  ;;  %934 = vadd.xlane.f32.xlu1 %v933_v45 }
 0x24d   :  { %1916 = vrot.lane.b32.xlu1 %v4666_v46, %s4107_s25 }
 0x251   :  { %2715 = vrot.lane.b32.xlu1 %v4677_v51, %s4107_s25 }
 0x252   :  { %1918 = vrot.lane.b32.xlu0 %v4672_v50, %s4107_s25 }
 0x255   :  { %2717 = vrot.lane.b32.xlu1 %v4683_v53, %s4107_s25 }
 0x256   :  { %1908 = vrot.lane.b32.xlu0 %v4666_v46, %s4109_s0 }
 0x259   :  { %1910 = vrot.lane.b32.xlu1 %v4672_v50, %s4109_s0 }
 0x25a   :  { %2707 = vrot.lane.b32.xlu0 %v4677_v51, %s4109_s0 }
 0x25d   :  { %2709 = vrot.lane.b32.xlu1 %v4683_v53, %s4109_s0 }
 0x25e   :  { %2078 = vrot.lane.b32.xlu0 %v4666_v46, %s4110_s26 }
 0x261   :  { %2080 = vrot.lane.b32.xlu1 %v4672_v50, %s4110_s26 }
 0x262   :  { %2877 = vrot.lane.b32.xlu0 %v4677_v51, %s4110_s26 }
 0x265   :  { %2879 = vrot.lane.b32.xlu1 %v4683_v53, %s4110_s26 }
 0x266   :  { %2165 = vrot.lane.b32.xlu0 %v4666_v46, %s4111_s27 }
 0x269   :  { %2167 = vrot.lane.b32.xlu1 %v4672_v50, %s4111_s27 }
 0x26a   :  { %2964 = vrot.lane.b32.xlu0 %v4677_v51, %s4111_s27 }
 0x26d   :  { %2966 = vrot.lane.b32.xlu1 %v4683_v53, %s4111_s27 }
 0x26e   :  { %2329 = vrot.lane.b32.xlu0 %v4666_v46, %s4112_s28 }
 0x271   :  { %2331 = vrot.lane.b32.xlu1 %v4672_v50, %s4112_s28 }
 0x272   :  { %3128 = vrot.lane.b32.xlu0 %v4677_v51, %s4112_s28 }
 0x275   :  { %3130 = vrot.lane.b32.xlu1 %v4683_v53, %s4112_s28 }
 0x276   :  { %2416 = vrot.lane.b32.xlu0 %v4666_v46, %s4113_s29 }
 0x279   :  { %2418 = vrot.lane.b32.xlu1 %v4672_v50, %s4113_s29 }
 0x27a   :  { %3215 = vrot.lane.b32.xlu0 %v4677_v51, %s4113_s29 }
 0x27d   :  { %3217 = vrot.lane.b32.xlu1 %v4683_v53, %s4113_s29 }
 0x27e   :  { %2503 = vrot.lane.b32.xlu0 %v4666_v46, %s4114_s30 }
 0x281   :  { %2505 = vrot.lane.b32.xlu1 %v4672_v50, %s4114_s30 }
 0x282   :  { %3302 = vrot.lane.b32.xlu0 %v4677_v51, %s4114_s30 }
 0x285   :  { %3304 = vrot.lane.b32.xlu1 %v4683_v53, %s4114_s30 }
 0x286   :  { %2590 = vrot.lane.b32.xlu0 %v4666_v46, %s4115_s7 }
 0x289   :  { %2592 = vrot.lane.b32.xlu1 %v4672_v50, %s4115_s7 }
 0x28a   :  { %3389 = vrot.lane.b32.xlu0 %v4677_v51, %s4115_s7 }
 0x28d   :  { %3391 = vrot.lane.b32.xlu1 %v4683_v53, %s4115_s7 }
 0x2c9   :  { %v1734_v12 = vpop.xlane.xlu0 %1733  ;;  %v935_v13 = vpop.xlane.xlu1 %934 }
 0x2ca   :  { %v1735_v14 = vmax.f32 %v1734_v12, 1e-24  ;;  %v936_v19 = vmax.f32 %v935_v13, 1e-24 }
 0x2cc   :  { %4001 = vrsqrt.f32 %v1735_v14 }
 0x2cd   :  { %4003 = vrsqrt.f32 %v936_v19  ;;  %v1917_v20 = vpop.permute.xlu1 %1916  ;;  %v1919_v22 = vpop.permute.xlu0 %1918 }
 0x2ce   :  { %v1920_v23 = vsel %vm5225_vm7, %v1917_v20, %v1919_v22  ;;  %vm5228_vm7 = vcmask 253952  }
 0x2cf   :  { %v1923_v26 = vsel %vm4257_vm1, %v1920_v23, 0.0  ;;  %vm5230_vm1 = vmmov %vm5227_vm5 }
 0x2d0   :  { %3771 = vmatprep.subr.msk.mxu0 %vm5176_vm4, %v1923_v26  ;;  %vm5229_vm4 = vmmov %vm5228_vm7  ;;  %v1921_v59 = vsel %vm5230_vm1, %v1919_v22, %v1917_v20  ;;  %vm5235_vm1 = vcmask 261120  }
 0x2d1   :  { %v2716_v3 = vpop.permute.xlu1 %2715  ;;  %v1909_v27 = vpop.permute.xlu0 %1908 }
 0x2d5   :  { %v2718_v30 = vpop.permute.xlu1 %2717  ;;  %v2708_v2 = vpop.permute.xlu0 %2707 }
 0x2d6   :  { %v4002_v0 = vpop.eup %4001  ;;  %v4787_v10 = vsel %vm5226_vm15, %v2716_v3, %v2718_v30  ;;  %v4791_v41 = vsel %vm5227_vm5, %v2718_v30, %v2716_v3  ;;  %vm5231_vm15 = vcmp.lt.s32.totalorder %v4245_v8, 17 }
 0x2d7   :  { %v4004_v43 = vpop.eup %4003  ;;  %v1737_v44 = vmul.f32 %v4002_v0, %v4652_v37  ;;  %vm5232_vm5 = vmmov %vm5231_vm15 }
 0x2d8   :  { %v938_v45 = vmul.f32 %v4004_v43, %v4655_v38  ;;  %vm5233_vm3 = vmmov %vm5232_vm5  ;;  %v1922_v38 = vsel %vm4263_vm2, %v1921_v59, 0.0 }
 0x2d9   :  { %1738 = vst.msk [vmem:[#allocation2 + $0x1] sm:$0x1] %vm5228_vm7, %v1737_v44  ;;  %v1911_v54 = vpop.permute.xlu1 %1910  ;;  %v2079_v55 = vpop.permute.xlu0 %2078  ;;  %vm5236_vm7 = vcmp.lt.s32.totalorder %v4245_v8, 15 }
 0x2da   :  { %939 = vst.msk [vmem:[#allocation2] sm:$0x1] %vm5229_vm4, %v938_v45  ;;  %v1912_v5 = vsel %vm5231_vm15, %v1909_v27, %v1911_v54  ;;  %vm5234_vm4 = vmmov %vm5233_vm3  ;;  %vm5237_vm15 = vcmask 1043456  }
 0x2db   :  { %v1913_v14 = vsel %vm5234_vm4, %v1911_v54, %v1909_v27  ;;  %v1915_v19 = vsel %vm4311_vm9, %v1912_v5, 0.0  ;;  %vm5240_vm4 = vmmov %vm5236_vm7 }
 0x2dc   :  { %v1914_v26 = vsel %vm4292_vm8, %v1913_v14, 0.0 }
 0x2dd   :  { %v2710_v60 = vpop.permute.xlu1 %2709  ;;  %v2878_v63 = vpop.permute.xlu0 %2877 }
 0x2de   :  { %v4803_v12 = vsel %vm5232_vm5, %v2708_v2, %v2710_v60  ;;  %v4807_v37 = vsel %vm5233_vm3, %v2710_v60, %v2708_v2  ;;  %vm5238_vm3 = vmmov %vm5237_vm15  ;;  %vm5239_vm5 = vcmask 31744  }
 0x2e1   :  { %v1739_v13 = vld [vmem:[#allocation2] sm:$0x3]  ;;  %v2081_v20 = vpop.permute.xlu1 %2080  ;;  %v2166_v22 = vpop.permute.xlu0 %2165 }
 0x2e2   :  { %3857 = vmatmul.mubr.msk.f32.vlgmr.msra.gmra.mrb[2].mxu0 %vm5235_vm1, %v1739_v13  ;;  %v2082_v23 = vsel %vm5236_vm7, %v2079_v55, %v2081_v20  ;;  %vm5241_vm1 = vmmov %vm5240_vm4 }
 0x2e3   :  { %3772 = vmatpush1.msk.msra.mxu0 %vm5237_vm15, %v1922_v38  ;;  %1994 = vmatprep.mubr.f32.mxu0 %v4108_v4  ;;  %v2085_v3 = vsel %vm4368_vm14, %v2082_v23, 0.0  ;;  %vm5242_vm7 = vmmov %vm5238_vm3 }
 0x2e4   :  { %3774 = vmatprep.subr.msk.mxu0 %vm5238_vm3, %v1915_v19  ;;  %vm5243_vm15 = vmmov %vm5238_vm3 }
 0x2e5   :  { %v2880_v27 = vpop.permute.xlu1 %2879  ;;  %v2965_v30 = vpop.permute.xlu0 %2964  ;;  %vm5244_vm3 = vmmov %vm5241_vm1 }
 0x2e6   :  { %3773 = vmatmul.mubr.msk.f32.vlgmr.msra.gmra.mrb[4].mxu0 %vm5239_vm5, %v4303_v31  ;;  %v4829_v2 = vsel %vm5240_vm4, %v2878_v63, %v2880_v27  ;;  %v4833_v0 = vsel %vm5241_vm1, %v2880_v27, %v2878_v63  ;;  %v2083_v43 = vsel %vm5244_vm3, %v2081_v20, %v2079_v55  ;;  %vm5245_vm5 = vcmp.lt.s32.totalorder %v4245_v8, 1 }
 0x2e7   :  { %3775 = vmatpush1.msk.msra.mxu0 %vm5242_vm7, %v1914_v26  ;;  %2071 = vmatprep.mubr.f32.mxu0 %v4108_v4  ;;  %v2084_v59 = vsel %vm4353_vm12, %v2083_v43, 0.0  ;;  %vm5246_vm4 = vnez %v5189_v21  ;;  %vm5247_vm1 = vcmask 31744   ;;  %vm5248_vm7 = vmmov %vm5245_vm5  ;;  %vm5250_vm3 = vcmask 1043456  }
 0x2e8   :  { %3777 = vmatprep.subr.msk.mxu0 %vm5243_vm15, %v2085_v3  ;;  %vm5249_vm15 = vmmov %vm5245_vm5  ;;  %v2884_v32 = vsel %vm4368_vm14, %v4829_v2, 0.0  ;;  %v2883_v17 = vsel %vm4353_vm12, %v4833_v0, 0.0 }
 0x2e9   :  { %v2168_v44 = vpop.permute.xlu1 %2167  ;;  %v2330_v45 = vpop.permute.xlu0 %2329 }
 0x2ea   :  { %v2169_v54 = vsel %vm5245_vm5, %v2166_v22, %v2168_v44  ;;  %vm5251_vm5 = vmmov %vm5250_vm3 }
 0x2eb   :  { %v2172_v60 = vsel %vm5246_vm4, %v2169_v54, 0.0  ;;  %vm5252_vm4 = vmmov %vm5248_vm7 }
 0x2ec   :  { %v2170_v13 = vsel %vm5252_vm4, %v2168_v44, %v2166_v22  ;;  %vm5257_vm4 = vmmov %vm5251_vm5 }
 0x2ed   :  { %v2967_v63 = vpop.permute.xlu1 %2966  ;;  %v3129_v5 = vpop.permute.xlu0 %3128 }
 0x2ee   :  { %3776 = vmatmul.mubr.msk.f32.vlgmr.msra.gmra.mrb[4].mxu0 %vm5247_vm1, %v4361_v48  ;;  %v4850_v38 = vsel %vm5248_vm7, %v2965_v30, %v2967_v63  ;;  %v4854_v55 = vsel %vm5249_vm15, %v2967_v63, %v2965_v30  ;;  %vm5253_vm1 = vnez %v5187_v18  ;;  %vm5254_vm7 = vcmask 31744  }
 0x2ef   :  { %3778 = vmatpush1.msk.msra.mxu0 %vm5250_vm3, %v2084_v59  ;;  %2156 = vmatprep.mubr.f32.mxu0 %v4108_v4  ;;  %v2171_v20 = vsel %vm5253_vm1, %v2170_v13, 0.0  ;;  %vm5255_vm15 = vcmp.lt.s32.totalorder %v4245_v8, 127 }
 0x2f0   :  { %3780 = vmatprep.subr.msk.mxu0 %vm5251_vm5, %v2172_v60  ;;  %vm5256_vm3 = vmmov %vm5255_vm15 }
 0x2f1   :  { %v2332_v14 = vpop.permute.xlu1 %2331  ;;  %v2417_v19 = vpop.permute.xlu0 %2416  ;;  %vm5258_vm1 = vmmov %vm5256_vm3 }
 0x2f2   :  { %v2334_v30 = vsel %vm5258_vm1, %v2332_v14, %v2330_v45  ;;  %vm5262_vm1 = vmmov %vm5257_vm4 }
 0x2f3   :  { %v2336_v43 = vsel %vm4337_vm11, %v2334_v30, 0.0 }
 0x2f5   :  { %v3131_v23 = vpop.permute.xlu1 %3130  ;;  %v3216_v27 = vpop.permute.xlu0 %3215 }
 0x2f6   :  { %3779 = vmatmul.mubr.msk.f32.vlgmr.msra.gmra.mrb[4].mxu0 %vm5254_vm7, %v4401_v62  ;;  %v4867_v26 = vsel %vm5255_vm15, %v3129_v5, %v3131_v23  ;;  %v4871_v3 = vsel %vm5256_vm3, %v3131_v23, %v3129_v5  ;;  %vm5259_vm15 = vcmp.lt.s32.totalorder %v4245_v8, 113 }
 0x2f7   :  { %3781 = vmatpush1.msk.msra.mxu0 %vm5251_vm5, %v2171_v20  ;;  %2243 = vmatprep.mubr.f32.mxu0 %v4108_v4  ;;  %vm5260_vm3 = vmmov %vm5259_vm15 }
 0x2f8   :  { %3783 = vmatprep.subr.msk.mxu0 %vm5257_vm4, %v4672_v50  ;;  %vm5261_vm5 = vmmov %vm5257_vm4  ;;  %vm5263_vm4 = vcmp.lt.s32.totalorder %v4245_v8, 127 }
 0x2f9   :  { %v2419_v22 = vpop.permute.xlu1 %2418  ;;  %v2504_v50 = vpop.permute.xlu0 %2503  ;;  %v2333_v60 = vsel %vm5263_vm4, %v2330_v45, %v2332_v14  ;;  %vm5268_vm4 = vmmov %vm5262_vm1 }
 0x2fa   :  { %v2335_v13 = vsel %vm4332_vm10, %v2333_v60, 0.0 }
 0x2fd   :  { %v3218_v44 = vpop.permute.xlu1 %3217  ;;  %v3303_v23 = vpop.permute.xlu0 %3302 }
 0x2fe   :  { %3782 = vmatmul.mubr.msk.f32.vlgmr.msra.gmra.mrb[4].mxu0 %vm5254_vm7, %v4434_v24  ;;  %v4885_v54 = vsel %vm5259_vm15, %v3216_v27, %v3218_v44  ;;  %v4889_v59 = vsel %vm5260_vm3, %v3218_v44, %v3216_v27  ;;  %vm5264_vm7 = vmmov %vm5260_vm3  ;;  %vm5265_vm15 = vcmask 31744   ;;  %vm5266_vm3 = vcmp.lt.s32.totalorder %v4245_v8, 112 }
 0x2ff   :  { %3784 = vmatpush1.msk.msra.mxu0 %vm5261_vm5, %v4666_v46  ;;  %2320 = vmatprep.mubr.f32.mxu0 %v4108_v4  ;;  %v2421_v5 = vsel %vm5264_vm7, %v2419_v22, %v2417_v19  ;;  %vm5267_vm5 = vmmov %vm5266_vm3  ;;  %v2420_v14 = vsel %vm5264_vm7, %v2417_v19, %v2419_v22 }
 0x300   :  { %3786 = vmatprep.subr.msk.mxu0 %vm5262_vm1, %v2336_v43  ;;  %v2423_v20 = vsel %vm4485_vm13, %v2421_v5, 0.0  ;;  %vm5269_vm13 = vmmov %vm5266_vm3 }
 0x301   :  { %v2506_v63 = vpop.permute.xlu1 %2505  ;;  %v2591_v60 = vpop.permute.xlu0 %2590  ;;  %vm5274_vm7 = vmmov %vm5269_vm13 }
 0x302   :  { %v2508_v30 = vsel %vm5269_vm13, %v2506_v63, %v2504_v50  ;;  %v2507_v19 = vsel %vm5274_vm7, %v2504_v50, %v2506_v63  ;;  %vm5275_vm13 = vcmp.lt.s32.totalorder %v4245_v8, 111 }
 0x303   :  { %vm5277_vm7 = vmmov %vm5275_vm13 }
 0x305   :  { %v3305_v46 = vpop.permute.xlu1 %3304 }
 0x306   :  { %3785 = vmatmul.mubr.msk.f32.vlgmr.msra.gmra.mrb[4].mxu0 %vm5265_vm15, %v4471_v9  ;;  %v4907_v27 = vsel %vm5266_vm3, %v3303_v23, %v3305_v46  ;;  %v4911_v45 = vsel %vm5267_vm5, %v3305_v46, %v3303_v23  ;;  %vm5270_vm15 = vnez %v5209_v11  ;;  %vm5271_vm3 = vnez %v5203_v29  ;;  %v38_v23 = vld [vmem:[%s5151_s2 + $0x88] sm:$0xff]  ;;  %v39_v46 = vld [vmem:[%s5151_s2 + $0x90] sm:$0xff] }
 0x307   :  { %3787 = vmatpush1.msk.msra.mxu0 %vm5262_vm1, %v2335_v13  ;;  %2407 = vmatprep.mubr.f32.mxu0 %v4108_v4  ;;  %v2422_v43 = vsel %vm5270_vm15, %v2420_v14, 0.0  ;;  %v2510_v44 = vsel %vm5271_vm3, %v2508_v30, 0.0  ;;  %vm5272_vm5 = vcmask 31744   ;;  %v2509_v13 = vsel %vm4495_vm0, %v2507_v19, 0.0  ;;  %vm5280_vm3 = vmmov %vm5262_vm1 }
 0x308   :  { %3789 = vmatprep.subr.msk.mxu0 %vm5268_vm4, %v2423_v20  ;;  %vm5273_vm4 = vmmov %vm5262_vm1  ;;  %v3221_v42 = vsel %vm5270_vm15, %v4885_v54, 0.0  ;;  %vm5309_vm15 = vnez %v5207_v40 }
 0x309   :  { %v2593_v5 = vpop.permute.xlu1 %2592  ;;  %vm5279_vm0 = vmmov %vm5272_vm5 }
 0x30a   :  { %v2595_v22 = vsel %vm5275_vm13, %v2593_v5, %v2591_v60  ;;  %v2594_v50 = vsel %vm5277_vm7, %v2591_v60, %v2593_v5  ;;  %vm5278_vm13 = vnez %v5218_v25  ;;  %vm5285_vm7 = vmmov %vm5280_vm3  ;;  %v2713_v5 = vsel %vm4292_vm8, %v4807_v37, 0.0 }
 0x30b   :  { %v2597_v20 = vsel %vm4571_vm6, %v2595_v22, 0.0  ;;  %v2596_v63 = vsel %vm5278_vm13, %v2594_v50, 0.0  ;;  %vm5290_vm8 = vnez %v5189_v21  ;;  %v3135_v21 = vsel %vm4337_vm11, %v4871_v3, 0.0  ;;  %v3769_v3 = vld [vmem:[%s5151_s2 + $0xa8] ss:$0 sm:$0xff] }
 0x30c   :  { %v2971_v28 = vsel %vm5290_vm8, %v4850_v38, 0.0 }
 0x30d   :  { %v3392_v49 = vpop.permute.xlu1 %3391 }
 0x30e   :  { %3788 = vmatmul.mubr.msk.f32.vlgmr.msra.gmra.mrb[4].mxu0 %vm5272_vm5, %v4525_v52 }
 0x30f   :  { %3790 = vmatpush1.msk.msra.mxu0 %vm5262_vm1, %v2422_v43  ;;  %2494 = vmatprep.mubr.f32.mxu0 %v4108_v4 }
 0x310   :  { %3792 = vmatprep.subr.msk.mxu0 %vm5273_vm4, %v2510_v44  ;;  %vm5276_vm4 = vmmov %vm5262_vm1 }
 0x316   :  { %3791 = vmatmul.mubr.msk.f32.vlgmr.msra.gmra.mrb[4].mxu0 %vm5272_vm5, %v4557_v7  ;;  %vm5281_vm5 = vmmov %vm5279_vm0 }
 0x317   :  { %3793 = vmatpush1.msk.msra.mxu0 %vm5262_vm1, %v2509_v13  ;;  %2581 = vmatprep.mubr.f32.mxu0 %v4108_v4  ;;  %vm5282_vm1 = vmmov 0  }
 0x318   :  { %3795 = vmatprep.subr.msk.mxu0 %vm5276_vm4, %v2597_v20  ;;  %vm5284_vm4 = vcmask 261120  }
 0x31e   :  { %3794 = vmatmul.mubr.msk.f32.vlgmr.msra.gmra.mrb[4].mxu0 %vm5279_vm0, %v4605_v1  ;;  %vm5283_vm0 = vnez %v5183_v16  ;;  %v2714_v16 = vsel %vm4311_vm9, %v4803_v12, 0.0  ;;  %vm5287_vm9 = vcmask 31744  }
 0x31f   :  { %3796 = vmatpush1.msk.msra.mxu0 %vm5280_vm3, %v2596_v63  ;;  %2668 = vmatprep.mubr.f32.mxu0 %v4108_v4  ;;  %v2722_v14 = vsel %vm5283_vm0, %v4787_v10, 0.0  ;;  %v2721_v10 = vsel %vm4263_vm2, %v4791_v41, 0.0  ;;  %vm5288_vm2 = vmmov %vm5280_vm3 }
 0x320   :  { %3904 = vmatprep.subr.bf16.mxu0 %v4117_v57  ;;  %vm5289_vm0 = vmmov %vm5288_vm2 }
 0x321   :  { %vm5292_vm14 = vmmov %vm5289_vm0 }
 0x322   :  { %vm5296_vm12 = vmmov %vm5289_vm0 }
 0x323   :  { %vm5299_vm8 = vmmov %vm5289_vm0 }
 0x326   :  { %3797 = vmatmul.mubr.msk.f32.vlgmr.msra.gmra.mrb[4].mxu0 %vm5281_vm5, %v4625_v34  ;;  %vm5286_vm5 = vmmov %vm5280_vm3 }
 0x327   :  { %3906 = vmatpush3.bf16.msra.mxu0 %v4699_v56  ;;  %3878 = vmatprep.mubr.msk.f32.mxu0 %vm5282_vm1, %v4108_v4  ;;  %v4967_v56 = vpack.c.bf16 %v39_v46, %v38_v23 }
 0x328   :  { %3907 = vmatprep.subr.bf16.mxu0 %v4117_v57 }
 0x329   :  { %3903 = vmatpush3.bf16.msra.mxu1 %v4967_v56 }
 0x32a   :  { %3799 = vmatprep.subr.msk.mxu1 %vm5280_vm3, %v2722_v14  ;;  %vm5291_vm3 = vmmov %vm5287_vm9 }
 0x32b   :  { %3909 = vmatpush3.bf16.msra.mxu0 %v4711_v61  ;;  %v4974_v61 = vld [vmem:[%s5151_s2 + $0xa0] ss:$0 sm:$0xff]  ;;  %s4119_s2 = smov [#allocation4]  }
 0x32c   :  { %s3673_s13 = sshll.u32 %s4119_s2, 4  ;;  %s3674_s13 = int_to_ptr.vmem [resolvable:$true] %s3673_s13 }
 0x32d   :  { %s4013_s16 = scalar_lea.vmem %s3674_s13, 32  ;;  %p4018_p1 = scmp.lt.s32.totalorder %s3674_s13, %s3674_s13 }
 0x32e   :  { %p4014_p0 = scmp.ne.s32.totalorder %s3674_s13, %s4013_s16  ;;  %p4019_p2 = scmp.lt.s32.totalorder %s4013_s16, %s4013_s16 }
 0x330   :  { %p4020_p3 = por %p4019_p2, %p4018_p1 }
 0x332   :  { %p4021_p4 = pnand %p4020_p3, %p4014_p0 }
 0x3b5   :  { %v1813_v30 = vpop.f32.mrb[2].mxu0 }
 0x3b6   :  { %v1814_v43 = vadd.f32 %v4974_v61, %v1813_v30  ;;  %v3858_v44 = vpop.f32.mrb[3].mxu0 }
 0x3b8   :  { %v1817_v60 = vmax.f32 %v1814_v43, 0.0 }
 0x3ba   :  { %3868 = vmatmul.mubr.msk.f32.vlgmr.msra.gmra.mrb[2].mxu1 %vm5284_vm4, %v1817_v60  ;;  %vm5293_vm4 = vmmov %vm5289_vm0 }
 0x3bb   :  { %3800 = vmatpush1.msk.msra.mxu1 %vm5285_vm7, %v2721_v10  ;;  %2793 = vmatprep.mubr.f32.mxu1 %v4108_v4  ;;  %vm5294_vm7 = vnez %v5187_v18  ;;  %v3134_v18 = vsel %vm4332_vm10, %v4867_v26, 0.0  ;;  %vm5304_vm10 = vnez %v5203_v29 }
 0x3bc   :  { %3802 = vmatprep.subr.msk.mxu1 %vm5286_vm5, %v2714_v16  ;;  %vm5295_vm5 = vmmov %vm5291_vm3  ;;  %v3309_v39 = vsel %vm5304_vm10, %v4911_v45, 0.0 }
 0x3be   :  { %3801 = vmatmul.mubr.msk.f32.vlgmr.msra.gmra.mrb[4].mxu1 %vm5287_vm9, %v4303_v31  ;;  %v2970_v31 = vsel %vm5294_vm7, %v4854_v55, 0.0  ;;  %vm5297_vm9 = vmmov %vm5289_vm0 }
 0x3bf   :  { %3803 = vmatpush1.msk.msra.mxu1 %vm5288_vm2, %v2713_v5  ;;  %2870 = vmatprep.mubr.f32.mxu1 %v4108_v4  ;;  %vm5298_vm2 = vmmov %vm5291_vm3 }
 0x3c0   :  { %3805 = vmatprep.subr.msk.mxu1 %vm5289_vm0, %v2884_v32  ;;  %vm5301_vm11 = vmmov %vm5298_vm2 }
 0x3c1   :  { %vm5305_vm7 = vmmov %vm5298_vm2 }
 0x3c6   :  { %3804 = vmatmul.mubr.msk.f32.vlgmr.msra.gmra.mrb[4].mxu1 %vm5291_vm3, %v4361_v48  ;;  %vm5300_vm3 = vnez %v5205_v36  ;;  %v3390_v48 = vpop.permute.xlu0 %3389 }
 0x3c7   :  { %3806 = vmatpush1.msk.msra.mxu1 %vm5292_vm14, %v2883_v17  ;;  %2955 = vmatprep.mubr.f32.mxu1 %v4108_v4  ;;  %v3222_v47 = vsel %vm5300_vm3, %v4889_v59, 0.0  ;;  %vm5302_vm14 = vmmov %vm5289_vm0 }
 0x3c8   :  { %3808 = vmatprep.subr.msk.mxu1 %vm5293_vm4, %v2971_v28  ;;  %vm5303_vm4 = vmmov %vm5289_vm0 }
 0x3ce   :  { %3807 = vmatmul.mubr.msk.f32.vlgmr.msra.gmra.mrb[4].mxu1 %vm5295_vm5, %v4401_v62  ;;  %vm5306_vm5 = vmmov %vm5289_vm0 }
 0x3cf   :  { %3809 = vmatpush1.msk.msra.mxu1 %vm5296_vm12, %v2970_v31  ;;  %3042 = vmatprep.mubr.f32.mxu1 %v4108_v4  ;;  %vm5307_vm12 = vmmov %vm5289_vm0 }
 0x3d0   :  { %3811 = vmatprep.subr.msk.mxu1 %vm5297_vm9, %v4683_v53  ;;  %vm5308_vm9 = vcmp.lt.s32.totalorder %v4245_v8, 111 }
 0x3d1   :  { %v3394_v62 = vsel %vm5308_vm9, %v3392_v49, %v3390_v48  ;;  %vm5311_vm3 = vmmov %vm5308_vm9 }
 0x3d2   :  { %v3396_v29 = vsel %vm4571_vm6, %v3394_v62, 0.0  ;;  %vm5314_vm6 = vmmov %vm5298_vm2 }
 0x3d6   :  { %3810 = vmatmul.mubr.msk.f32.vlgmr.msra.gmra.mrb[4].mxu1 %vm5298_vm2, %v4434_v24  ;;  %v3308_v24 = vsel %vm5309_vm15, %v4907_v27, 0.0 }
 0x3d7   :  { %3812 = vmatpush1.msk.msra.mxu1 %vm5289_vm0, %v4677_v51  ;;  %3119 = vmatprep.mubr.f32.mxu1 %v4108_v4 }
 0x3d8   :  { %3814 = vmatprep.subr.msk.mxu1 %vm5299_vm8, %v3135_v21  ;;  %vm5310_vm8 = vmmov %vm5289_vm0 }
 0x3de   :  { %3813 = vmatmul.mubr.msk.f32.vlgmr.msra.gmra.mrb[4].mxu1 %vm5301_vm11, %v4471_v9  ;;  %v3393_v9 = vsel %vm5311_vm3, %v3390_v48, %v3392_v49  ;;  %vm5312_vm11 = vmmov %vm5298_vm2 }
 0x3df   :  { %3815 = vmatpush1.msk.msra.mxu1 %vm5302_vm14, %v3134_v18  ;;  %3206 = vmatprep.mubr.f32.mxu1 %v4108_v4  ;;  %v3395_v36 = vsel %vm5278_vm13, %v3393_v9, 0.0  ;;  %vm5313_vm14 = vmmov %vm5289_vm0  ;;  %vm5315_vm13 = vcmask 261120  }
 0x3e0   :  { %3817 = vmatprep.subr.msk.mxu1 %vm5303_vm4, %v3222_v47  ;;  %vm1896_vm4 = vcmask 254976  }
 0x3e6   :  { %3816 = vmatmul.mubr.msk.f32.vlgmr.msra.gmra.mrb[4].mxu1 %vm5305_vm7, %v4525_v52  ;;  %vm5318_vm7 = vmmov %vm5315_vm13 }
 0x3e7   :  { %3818 = vmatpush1.msk.msra.mxu1 %vm5306_vm5, %v3221_v42  ;;  %3293 = vmatprep.mubr.f32.mxu1 %v4108_v4  ;;  %vm5321_vm9 = vmmov %vm5318_vm7 }
 0x3e8   :  { %3820 = vmatprep.subr.msk.mxu1 %vm5307_vm12, %v3309_v39  ;;  %vm5322_vm15 = vmmov %vm5318_vm7 }
 0x3ee   :  { %3819 = vmatmul.mubr.msk.f32.vlgmr.msra.gmra.mrb[4].mxu1 %vm5298_vm2, %v4557_v7 }
 0x3ef   :  { %3821 = vmatpush1.msk.msra.mxu1 %vm5289_vm0, %v3308_v24  ;;  %3380 = vmatprep.mubr.f32.mxu1 %v4108_v4 }
 0x3f0   :  { %3823 = vmatprep.subr.msk.mxu1 %vm5310_vm8, %v3396_v29 }
 0x3f6   :  { %3822 = vmatmul.mubr.msk.f32.vlgmr.msra.gmra.mrb[4].mxu1 %vm5312_vm11, %v4605_v1 }
 0x3f7   :  { %3824 = vmatpush1.msk.msra.mxu1 %vm5313_vm14, %v3395_v36  ;;  %3467 = vmatprep.mubr.f32.mxu1 %v4108_v4 }
 0x3f8   :  { %3910 = vmatprep.subr.bf16.mxu1 %v4117_v57 }
 0x3f9   :  { %v2670_v40 = vpop.f32.mrb[4].mxu0 }
 0x3fa   :  { %v2677_v11 = vadd.f32 %v2670_v40, %v4631_v35  ;;  %v2672_v52 = vpop.f32.mrb[5].mxu0 }
 0x3fb   :  { %v2678_v7 = vadd.f32 %v2672_v52, %v4631_v35 }
 0x3fc   :  { %v2679_v8 = vmax.f32 %v2677_v11, 0.0 }
 0x3fd   :  { %v2680_v15 = vmax.f32 %v2678_v7, 0.0 }
 0x3fe   :  { %3825 = vmatmul.mubr.msk.f32.vlgmr.msra.gmra.mrb[4].mxu1 %vm5314_vm6, %v4625_v34 }
 0x3ff   :  { %v2681_v25 = vadd.f32 %v2680_v15, %v2679_v8  ;;  %3912 = vmatpush3.bf16.msra.mxu1 %v4776_v6  ;;  %3889 = vmatprep.mubr.msk.f32.mxu1 %vm5282_vm1, %v4108_v4  ;;  %vm5316_vm1 = vcmask 253952  }
 0x400   :  { %3913 = vmatprep.subr.bf16.mxu1 %v4117_v57  ;;  %vm5317_vm10 = vmmov %vm5316_vm1 }
 0x401   :  { %2682 = vadd.xlane.f32.xlu0 %v2681_v25  ;;  %vm5319_vm5 = vmmov %vm5316_vm1 }
 0x402   :  { %vm5320_vm12 = vmmov %vm5316_vm1 }
 0x403   :  { %3915 = vmatpush3.bf16.msra.mxu1 %v4967_v56 }
 0x48d   :  { %v1891_v1 = vpop.f32.mrb[2].mxu1 }
 0x48e   :  { %v3869_v51 = vpop.f32.mrb[3].mxu1  ;;  %v2683_v53 = vpop.xlane.xlu0 %2682  ;;  %v1892_v19 = vadd.f32 %v3769_v3, %v1891_v1 }
 0x48f   :  { %v2684_v41 = vmul.f32 0.00390625, %v2683_v53 }
 0x490   :  { %v1895_v50 = vmul.f32 %v1892_v19, %v1892_v19 }
 0x491   :  { %v2685_v12 = vmul.f32 %v2684_v41, %v4640_v58 }
 0x492   :  { %v1897_v63 = vsel %vm1896_vm4, %v1895_v50, 0.0 }
 0x493   :  { %v2686_v37 = vsel %vm5315_vm13, %v2685_v12, 0.0 }
 0x494   :  { %v2687_v34 = vrot.slane %v2686_v37, 4 }
 0x496   :  { %v2688_v2 = vadd.f32 %v2687_v34, %v2686_v37 }
 0x498   :  { %v2689_v0 = vrot.slane %v2688_v2, 2 }
 0x49a   :  { %v2690_v6 = vadd.f32 %v2689_v0, %v2688_v2 }
 0x49c   :  { %v2691_v38 = vrot.slane %v2690_v6, 1 }
 0x49e   :  { %v2692_v55 = vadd.f32 %v2691_v38, %v2690_v6 }
 0x4a0   :  { %v2693_v4 = vadd.f32 %v2692_v55, %v4649_v33 }
 0x4a2   :  { %v2694_v57 = vmul.f32 %v2693_v4, %v2693_v4 }
 0x4a4   :  { %v2695_v26 = vsel %vm5316_vm1, %v2694_v57, 0.0 }
 0x4a5   :  { %2696 = vadd.xlane.f32.xlu0 %v2695_v26 }
 0x4d1   :  { %v3469_v54 = vpop.f32.mrb[4].mxu1 }
 0x4d2   :  { %v3476_v59 = vadd.f32 %v3469_v54, %v4631_v35  ;;  %v3471_v27 = vpop.f32.mrb[5].mxu1 }
 0x4d3   :  { %v3477_v45 = vadd.f32 %v3471_v27, %v4631_v35 }
 0x4d4   :  { %v3478_v22 = vmax.f32 %v3476_v59, 0.0 }
 0x4d5   :  { %v3479_v13 = vmax.f32 %v3477_v45, 0.0 }
 0x4d7   :  { %v3480_v20 = vadd.f32 %v3479_v13, %v3478_v22 }
 0x4d9   :  { %3481 = vadd.xlane.f32.xlu1 %v3480_v20 }
 0x4dd   :  { %1898 = vadd.xlane.f32.xlu1 %v1897_v63 }
 0x532   :  { %v2697_v23 = vpop.xlane.xlu0 %2696 }
 0x533   :  { %v2698_v46 = vmax.f32 %v2697_v23, 1e-24 }
 0x535   :  { %4005 = vrsqrt.f32 %v2698_v46 }
 0x53f   :  { %v4006_v14 = vpop.eup %4005 }
 0x540   :  { %v2700_v56 = vmul.f32 %v4006_v14, %v2693_v4 }
 0x542   :  { %2701 = vst.msk [vmem:[#allocation6] sm:$0x1] %vm5317_vm10, %v2700_v56 }
 0x566   :  { %v3482_v30 = vpop.xlane.xlu1 %3481 }
 0x567   :  { %v3483_v43 = vmul.f32 0.00390625, %v3482_v30 }
 0x569   :  { %v3484_v35 = vmul.f32 %v3483_v43, %v4640_v58 }
 0x56a   :  { %v1899_v44 = vpop.xlane.xlu1 %1898 }
 0x56b   :  { %v3485_v60 = vsel %vm5318_vm7, %v3484_v35, 0.0  ;;  %v1900_v16 = vmax.f32 %v1899_v44, 1e-24 }
 0x56c   :  { %v3486_v10 = vrot.slane %v3485_v60, 4 }
 0x56d   :  { %4007 = vrsqrt.f32 %v1900_v16 }
 0x56e   :  { %v3487_v5 = vadd.f32 %v3486_v10, %v3485_v60 }
 0x570   :  { %v3488_v32 = vrot.slane %v3487_v5, 2 }
 0x572   :  { %v3489_v17 = vadd.f32 %v3488_v32, %v3487_v5 }
 0x574   :  { %v3490_v28 = vrot.slane %v3489_v17, 1 }
 0x576   :  { %v3491_v31 = vadd.f32 %v3490_v28, %v3489_v17 }
 0x577   :  { %v4008_v21 = vpop.eup %4007 }
 0x578   :  { %v3492_v18 = vadd.f32 %v3491_v31, %v4649_v33  ;;  %v1902_v47 = vmul.f32 %v4008_v21, %v1892_v19 }
 0x57a   :  { %v3493_v42 = vmul.f32 %v3492_v18, %v3492_v18  ;;  %1903 = vst.msk [vmem:[#allocation4] sm:$0x3] %vm1896_vm4, %v1902_v47 }
 0x57c   :  { %v3494_v58 = vsel %vm5319_vm5, %v3493_v42, 0.0 }
 0x57d   :  { %3495 = vadd.xlane.f32.xlu0 %v3494_v58 }
 0x60a   :  { %v3496_v39 = vpop.xlane.xlu0 %3495 }
 0x60b   :  { %v3497_v48 = vmax.f32 %v3496_v39, 1e-24 }
 0x60d   :  { %4009 = vrsqrt.f32 %v3497_v48 }
 0x617   :  { %v4010_v49 = vpop.eup %4009 }
 0x618   :  { %v3499_v62 = vmul.f32 %v4010_v49, %v3492_v18 }
 0x61a   :  { %3500 = vst.msk [vmem:[#allocation6 + $0x1] sm:$0x1] %vm5320_vm12, %v3499_v62 }
 0x621   :  { %v3501_v24 = vld [vmem:[#allocation6] sm:$0x3] }
 0x622   :  { %3879 = vmatmul.mubr.msk.f32.vlgmr.msra.gmra.mrb[6].mxu0 %vm5321_vm9, %v3501_v24 }
 0x6f5   :  { %v3571_v29 = vpop.f32.mrb[6].mxu0 }
 0x6f6   :  { %v3572_v33 = vadd.f32 %v4974_v61, %v3571_v29  ;;  %v3880_v9 = vpop.f32.mrb[7].mxu0 }
 0x6f8   :  { %v3575_v36 = vmax.f32 %v3572_v33, 0.0 }
 0x6fa   :  { %3890 = vmatmul.mubr.msk.f32.vlgmr.msra.gmra.mrb[6].mxu1 %vm5322_vm15, %v3575_v36 }
 0x7cd   :  { %v3645_v40 = vpop.f32.mrb[6].mxu1 }
 0x7ce   :  { %v3646_v11 = vadd.f32 %v3769_v3, %v3645_v40  ;;  %v3891_v52 = vpop.f32.mrb[7].mxu1 }
 0x7d0   :  { %v3649_v7 = vmul.f32 %v3646_v11, %v3646_v11 }
 0x7d2   :  { %v3650_v8 = vsel %vm1896_vm4, %v3649_v7, 0.0 }
 0x7d3   :  { %3651 = vadd.xlane.f32.xlu0 %v3650_v8 }
 0x7d4   :  { %4024 = shalt.err (!%p4021_p4)
}
 0x7d5   :  { %s4025_s19 = scalar_lea.hbm %s5153_s4, 32 }
 0x7d6   :  { %p4026_p5 = scmp.ne.s32.totalorder %s5153_s4, %s4025_s19  ;;  %p4029_p6 = scmp.lt.u32.totalorder %s4025_s19, %s5153_s4 }
 0x7d8   :  { %p4031_p7 = pnand %p4029_p6, %p4026_p5 }
 0x7da   :  { %4034 = shalt.err (!%p4031_p7)
}
 0x7db   :  { %3676 = dma.vmem_to_hbm [thread:$0]  %s3674_s13, 32, %s5153_s4, [#allocation5]  }
 0x7dc   :  { %s4035_s24 = scalar_lea.vmem %s3664_s15, 32  ;;  %p4040_p9 = scmp.lt.s32.totalorder %s3664_s15, %s3664_s15 }
 0x7dd   :  { %p4036_p8 = scmp.ne.s32.totalorder %s3664_s15, %s4035_s24  ;;  %p4041_p10 = scmp.lt.s32.totalorder %s4035_s24, %s4035_s24 }
 0x7df   :  { %p4042_p11 = por %p4041_p10, %p4040_p9 }
 0x7e1   :  { %p4043_p12 = pnand %p4042_p11, %p4036_p8 }
 0x7e3   :  { %4046 = shalt.err (!%p4043_p12)
}
 0x7e4   :  { %s4047_s27 = scalar_lea.hbm %s5152_s3, 32 }
 0x7e5   :  { %p4048_p13 = scmp.ne.s32.totalorder %s5152_s3, %s4047_s27  ;;  %p4051_p0 = scmp.lt.u32.totalorder %s4047_s27, %s5152_s3 }
 0x7e7   :  { %p4053_p1 = pnand %p4051_p0, %p4048_p13 }
 0x7e9   :  { %4056 = shalt.err (!%p4053_p1)
}
 0x7ea   :  { %3666 = dma.vmem_to_hbm [thread:$0]  %s3664_s15, 32, %s5152_s3, [#allocation3]  }
 0x7eb   :  { %s4121_s9 = smov [#allocation6]  }
 0x7ec   :  { %s3683_s10 = sshll.u32 %s4121_s9, 4  ;;  %s3684_s10 = int_to_ptr.vmem [resolvable:$true] %s3683_s10 }
 0x7ed   :  { %s4057_s11 = scalar_lea.vmem %s3684_s10, 32  ;;  %p4062_p3 = scmp.lt.s32.totalorder %s3684_s10, %s3684_s10 }
 0x7ee   :  { %p4058_p2 = scmp.ne.s32.totalorder %s3684_s10, %s4057_s11  ;;  %p4063_p4 = scmp.lt.s32.totalorder %s4057_s11, %s4057_s11 }
 0x7f0   :  { %p4064_p5 = por %p4063_p4, %p4062_p3 }
 0x7f2   :  { %p4065_p6 = pnand %p4064_p5, %p4058_p2 }
 0x7f4   :  { %4068 = shalt.err (!%p4065_p6)
}
 0x7f5   :  { %s4069_s13 = scalar_lea.hbm %s5154_s5, 32 }
 0x7f6   :  { %p4070_p7 = scmp.ne.s32.totalorder %s5154_s5, %s4069_s13  ;;  %p4073_p8 = scmp.lt.u32.totalorder %s4069_s13, %s5154_s5 }
 0x7f8   :  { %p4075_p9 = pnand %p4073_p8, %p4070_p7 }
 0x7fa   :  { %4078 = shalt.err (!%p4075_p9)
}
 0x7fb   :  { %3686 = dma.vmem_to_hbm [thread:$0]  %s3684_s10, 32, %s5154_s5, [#allocation5]  }
 0x7fc   :  { %s4122_s19 = smov [#allocation7]  }
 0x7fd   :  { %s3693_s20 = sshll.u32 %s4122_s19, 4  ;;  %s3694_s20 = int_to_ptr.vmem [resolvable:$true] %s3693_s20 }
 0x7fe   :  { %s4079_s1 = scalar_lea.vmem %s3694_s20, 32  ;;  %p4084_p11 = scmp.lt.s32.totalorder %s3694_s20, %s3694_s20 }
 0x7ff   :  { %p4080_p10 = scmp.ne.s32.totalorder %s3694_s20, %s4079_s1  ;;  %p4085_p12 = scmp.lt.s32.totalorder %s4079_s1, %s4079_s1 }
 0x801   :  { %p4086_p13 = por %p4085_p12, %p4084_p11 }
 0x803   :  { %p4087_p0 = pnand %p4086_p13, %p4080_p10 }
 0x860   :  { %v3652_v61 = vpop.xlane.xlu0 %3651 }
 0x861   :  { %v3653_v15 = vmax.f32 %v3652_v61, 1e-24 }
 0x863   :  { %4011 = vrsqrt.f32 %v3653_v15 }
 0x86d   :  { %v4012_v25 = vpop.eup %4011 }
 0x86e   :  { %v3655_v1 = vmul.f32 %v4012_v25, %v3646_v11 }
 0x870   :  { %3656 = vst.msk [vmem:[#allocation7] sm:$0x3] %vm1896_vm4, %v3655_v1 }
 0x871   :  { %4090 = shalt.err (!%p4087_p0)
}
 0x872   :  { %s4091_s5 = scalar_lea.hbm %s5155_s6, 32 }
 0x873   :  { %p4092_p1 = scmp.ne.s32.totalorder %s5155_s6, %s4091_s5  ;;  %p4095_p2 = scmp.lt.u32.totalorder %s4091_s5, %s5155_s6 }
 0x875   :  { %p4097_p3 = pnand %p4095_p2, %p4092_p1 }
 0x877   :  { %4100 = shalt.err (!%p4097_p3)
}
 0x878   :  { %3696 = dma.vmem_to_hbm [thread:$0]  %s3694_s20, 32, %s5155_s6, [#allocation8]  }
 0x879   :  { %4101 = dma.done.wait [#allocation3], 32  }
 0x87a   :  { %4102 = vsyncadd [#allocation3], 4294967264 }
 0x87b   :  { %4103 = dma.done.wait [#allocation5], 64  }
 0x87c   :  { %4104 = vsyncadd [#allocation5], 4294967232 }
 0x87d   :  { %4105 = dma.done.wait [#allocation8], 32  }
 0x87e   :  { %4106 = vsyncadd [#allocation8], 4294967264 }
 0x87f   :  { %3709 = vsyncpa [#allocation3], 1 }
 0x880   :  { %3710 = vsyncpa [#allocation5], 1 }
 0x881   :  { %3711 = vsyncpa [#allocation8], 1 }

</bundles_post_ra>
